<compile_context>
chip_gen: v7x
topology: tpu7x:2x2x1
jax: 0.10.0
libtpu: 0.0.40
codegen_flags: <defaults>
</compile_context>

<pallas_src>
import jax
import jax.numpy as jnp
from jax import lax
from jax.experimental import pallas as pl
from jax.experimental.pallas import tpu as pltpu


def _make_gtnet_kernel(H, W, K, R, n_class, im_channel, bb):
    KK = K * K
    S = W + 2 * R                 # per-batch-strip lane width (with halos)
    Lout = bb * S                 # lane width of output-layout arrays
    L = Lout + 2 * R              # lane width of padded-input buffers

    def kernel(motion_ref,        # (1, H+2R, L) int32, padded with -1
               im_ref,            # (1, im_channel, H+2R, L) f32, zero padded
               w_ref,             # SMEM (n_class*K*K,) f32
               pred_ref,          # (1, im_channel, H, Lout) f32
               mask_ref,          # (1, n_class, H+2R, L) f32 (padded layout)
               dis_ref,           # (1, 1, H, Lout) f32  (= 1 - appear)
               field_ref,         # VMEM scratch (K*K, H, Lout) f32
               app_ref):          # VMEM scratch (H+2R, L) f32
        # Hoist all SMEM weight reads out of the unrolled loops.
        wv = [w_ref[i] for i in range(n_class * KK)]

        # ---- label2mask ----------------------------------------------------
        # Padded one-hot masks are written straight into the mask output
        # block, which doubles as the VMEM buffer the shifted-window reads
        # slice from.  Halo lanes/rows are 0 automatically (motion padded
        # with -1, which never matches a class id).
        motion = motion_ref[0, :, :]                             # (H+2R, L)
        for c in range(n_class):
            mask_ref[0, c, :, :] = (motion == c).astype(jnp.float32)

        # ---- construct_seg: per-offset weighted fields + their sum ---------
        #   field_t[y,q] = sum_c mask_pad[c, y+ky, q+kx] * w[c, ky, kx]
        #   seg          = sum_t field_t  (== F.conv2d(m_mask, m_kernel, pad=R))
        # NOTE: fully unrolled; for much larger K/n_class switch these Python
        # loops to lax.fori_loop over an indexable weight table.
        seg = None
        for t in range(KK):
            ky, kx = divmod(t, K)
            f = None
            for c in range(n_class):
                v = mask_ref[0, c, pl.ds(ky, H), pl.ds(kx, Lout)] * wv[c * KK + t]
                f = v if f is None else f + v
            field_ref[t, :, :] = f
            seg = f if seg is None else seg + f

        # ---- disappear / appear (single clip instead of relu/relu chain) ---
        dis = jnp.clip(seg - 1.0, 0.0, 1.0)        # == 1 - appear
        appear = 1.0 - dis
        dis_ref[0, 0, :, :] = dis

        # ---- construct_image -------------------------------------------------
        # Embed `appear` into the padded strip layout (zeroed first so
        # uninitialised VMEM can never leak NaNs through 0*NaN), then fold it
        # into the per-offset fields ONCE:
        #   pred_i = sum_t shift_t(im_pad_i) * [shift_t(appear_pad) * field_t]
        # The fold is fused with the channel-0 accumulation so channel 0 never
        # re-reads the folded field from VMEM.
        app_ref[...] = jnp.zeros_like(app_ref)
        app_ref[pl.ds(R, H), pl.ds(R, Lout)] = appear

        acc0 = None
        for t in range(KK):
            ky, kx = divmod(t, K)
            faf = app_ref[pl.ds(ky, H), pl.ds(kx, Lout)] * field_ref[t, :, :]
            if im_channel > 1:
                field_ref[t, :, :] = faf        # only needed for channels >= 1
            v = im_ref[0, 0, pl.ds(ky, H), pl.ds(kx, Lout)] * faf
            acc0 = v if acc0 is None else acc0 + v
        pred_ref[0, 0, :, :] = acc0

        for i in range(1, im_channel):
            acc = None
            for t in range(KK):
                ky, kx = divmod(t, K)
                v = im_ref[0, i, pl.ds(ky, H), pl.ds(kx, Lout)] * field_ref[t, :, :]
                acc = v if acc is None else acc + v
            pred_ref[0, i, :, :] = acc

    return kernel


def _pick_batch_block(B, H, W, K, R, n_class, im_channel,
                      vmem_budget_bytes=24 * 1024 * 1024):
    """Largest divisor of B whose per-step VMEM footprint fits the budget."""
    pp = (H + 2 * R) * (W + 2 * R)
    po = H * (W + 2 * R)
    per_elem = 4 * (2 * (1 + im_channel) * pp                      # inputs (x2 dbl-buf)
                    + 2 * ((im_channel + 1) * po + n_class * pp)   # outputs (x2)
                    + K * K * po + pp)                             # scratch
    bb = 1
    for d in range(1, B + 1):
        if B % d == 0 and d * per_elem <= vmem_budget_bytes:
            bb = d
    return bb


def gtnet_forward(im_input, gt_motion, m_kernel, *, im_channel, n_class, m_range,
                  batch_block=None):
    """Pallas implementation of GtNet.forward -> (pred, m_mask, 1 - appear)."""
    B, _, H, W = gt_motion.shape
    K = 2 * m_range + 1
    R = m_range
    assert m_kernel.shape == (1, n_class, K, K)

    bb = batch_block if batch_block is not None else _pick_batch_block(
        B, H, W, K, R, n_class, im_channel)
    assert B % bb == 0
    nblk = B // bb
    S = W + 2 * R
    Lout = bb * S
    L = Lout + 2 * R

    # ---- wrapper glue: pad and fold batch into lane strips ------------------
    motion = gt_motion[:, 0].astype(jnp.int32)                               # (B,H,W)
    motion_p = jnp.pad(motion, ((0, 0), (R, R), (R, R)), constant_values=-1)
    motion_p = motion_p.reshape(nblk, bb, H + 2 * R, S)
    motion_p = motion_p.transpose(0, 2, 1, 3).reshape(nblk, H + 2 * R, Lout)
    motion_p = jnp.pad(motion_p, ((0, 0), (0, 0), (0, 2 * R)), constant_values=-1)

    im = im_input[:, -im_channel:, :, :].astype(jnp.float32)                 # (B,C,H,W)
    im_p = jnp.pad(im, ((0, 0), (0, 0), (R, R), (R, R)))
    im_p = im_p.reshape(nblk, bb, im_channel, H + 2 * R, S)
    im_p = im_p.transpose(0, 2, 3, 1, 4).reshape(nblk, im_channel, H + 2 * R, Lout)
    im_p = jnp.pad(im_p, ((0, 0), (0, 0), (0, 0), (0, 2 * R)))

    w_flat = m_kernel.reshape(-1).astype(jnp.float32)

    kernel = _make_gtnet_kernel(H, W, K, R, n_class, im_channel, bb)

    out_shape = (
        jax.ShapeDtypeStruct((nblk, im_channel, H, Lout), jnp.float32),      # pred (strip)
        jax.ShapeDtypeStruct((nblk, n_class, H + 2 * R, L), jnp.float32),    # mask (padded strip)
        jax.ShapeDtypeStruct((nblk, 1, H, Lout), jnp.float32),               # 1 - appear (strip)
    )
    pred_s, mask_s, dis_s = pl.pallas_call(
        kernel,
        out_shape=out_shape,
        grid=(nblk,),
        in_specs=[
            pl.BlockSpec((1, H + 2 * R, L), lambda b: (b, 0, 0)),
            pl.BlockSpec((1, im_channel, H + 2 * R, L), lambda b: (b, 0, 0, 0)),
            pl.BlockSpec(memory_space=pltpu.MemorySpace.SMEM),
        ],
        out_specs=(
            pl.BlockSpec((1, im_channel, H, Lout), lambda b: (b, 0, 0, 0)),
            pl.BlockSpec((1, n_class, H + 2 * R, L), lambda b: (b, 0, 0, 0)),
            pl.BlockSpec((1, 1, H, Lout), lambda b: (b, 0, 0, 0)),
        ),
        scratch_shapes=[
            pltpu.VMEM((K * K, H, Lout), jnp.float32),
            pltpu.VMEM((H + 2 * R, L), jnp.float32),
        ],
        compiler_params=pltpu.CompilerParams(
            dimension_semantics=("parallel",),
            vmem_limit_bytes=32 * 1024 * 1024,
        ),
    )(motion_p, im_p, w_flat)

    # ---- wrapper glue: unfold strips back to NCHW ---------------------------
    def unstrip(y, C):                      # (nblk, C, H, Lout) -> (B, C, H, W)
        y = y.reshape(nblk, C, H, bb, S)[..., :W]
        return y.transpose(0, 3, 1, 2, 4).reshape(B, C, H, W)

    pred = unstrip(pred_s, im_channel)
    dis = unstrip(dis_s, 1)
    mask = mask_s[..., :Lout].reshape(nblk, n_class, H + 2 * R, bb, S)
    mask = mask[:, :, R:R + H, :, R:R + W]
    mask = mask.transpose(0, 3, 1, 2, 4).reshape(B, n_class, H, W)
    return pred, mask, dis


def gtnet_reference(im_input, gt_motion, m_kernel, *, im_channel, n_class, m_range):
    """Pure-JAX reference (mirrors the PyTorch forward) for correctness checking."""
    m_mask = jax.nn.one_hot(gt_motion[:, 0], n_class, axis=1, dtype=jnp.float32)
    dn = lax.conv_dimension_numbers(m_mask.shape, m_kernel.shape, ("NCHW", "OIHW", "NCHW"))
    pad = [(m_range, m_range), (m_range, m_range)]
    seg = lax.conv_general_dilated(m_mask, m_kernel, (1, 1), pad,
                                   dimension_numbers=dn,
                                   precision=lax.Precision.HIGHEST)
    disappear = jax.nn.relu(seg - 1.0)
    appear = jax.nn.relu(1.0 - disappear)
    im = im_input[:, -im_channel:, :, :] * appear
    preds = []
    for i in range(im_channel):
        x = im[:, i:i + 1, :, :] * m_mask
        preds.append(lax.conv_general_dilated(x, m_kernel, (1, 1), pad,
                                              dimension_numbers=dn,
                                              precision=lax.Precision.HIGHEST))
    pred = jnp.concatenate(preds, axis=1)
    return pred, m_mask, 1.0 - appear


if __name__ == "__main__":
    B, H, W = 2, 16, 16
    im_channel, n_inputs, n_class, m_range = 3, 2, 4, 1
    K = 2 * m_range + 1

    key = jax.random.PRNGKey(0)
    k1, k2, k3 = jax.random.split(key, 3)
    im_input = jax.random.uniform(k1, (B, n_inputs * im_channel, H, W), dtype=jnp.float32)
    gt_motion = jax.random.randint(k2, (B, 1, H, W), 0, n_class, dtype=jnp.int32)
    m_kernel = jax.random.uniform(k3, (1, n_class, K, K), dtype=jnp.float32)

    pred, m_mask, not_appear = gtnet_forward(
        im_input, gt_motion, m_kernel,
        im_channel=im_channel, n_class=n_class, m_range=m_range)
    jax.block_until_ready((pred, m_mask, not_appear))

    pred_r, mask_r, not_appear_r = gtnet_reference(
        im_input, gt_motion, m_kernel,
        im_channel=im_channel, n_class=n_class, m_range=m_range)

    assert pred.shape == (B, im_channel, H, W)
    assert m_mask.shape == (B, n_class, H, W)
    assert not_appear.shape == (B, 1, H, W)
    assert jnp.allclose(m_mask, mask_r, atol=1e-5), "m_mask mismatch"
    assert jnp.allclose(not_appear, not_appear_r, atol=1e-4), "(1 - appear) mismatch"
    assert jnp.allclose(pred, pred_r, atol=1e-4), "pred mismatch"

    print("KERNEL_OK")
</pallas_src>

<mosaic_0001>
module attributes {stable_mosaic.version = 11 : i64} {
  func.func @kernel(%arg0: i32, %arg1: memref<1x18x38xi32, #tpu.memory_space<vmem>>, %arg2: memref<1x3x18x38xf32, #tpu.memory_space<vmem>>, %arg3: memref<36xf32, #tpu.memory_space<smem>>, %arg4: memref<1x3x16x36xf32, #tpu.memory_space<vmem>>, %arg5: memref<1x4x18x38xf32, #tpu.memory_space<vmem>>, %arg6: memref<1x1x16x36xf32, #tpu.memory_space<vmem>>, %arg7: memref<9x16x36xf32, #tpu.memory_space<vmem>>, %arg8: memref<18x38xf32, #tpu.memory_space<vmem>>) attributes {dimension_semantics = [#tpu.dimension_semantics<parallel>], iteration_bounds = array<i64: 1>, scalar_prefetch = 0 : i64, scratch_operands = 2 : i64, tpu.core_type = #tpu.core_type<tc>, window_params = [{transform_indices = @transform_0, window_bounds = array<i64: 1, 18, 38>}, {transform_indices = @transform_1, window_bounds = array<i64: 1, 3, 18, 38>}, {transform_indices = @transform_2, window_bounds = array<i64: 36>}, {transform_indices = @transform_3, window_bounds = array<i64: 1, 3, 16, 36>}, {transform_indices = @transform_4, window_bounds = array<i64: 1, 4, 18, 38>}, {transform_indices = @transform_5, window_bounds = array<i64: 1, 1, 16, 36>}]} {
    %c0 = arith.constant 0 : index
    %0 = memref.load %arg3[%c0] : memref<36xf32, #tpu.memory_space<smem>>
    %c1 = arith.constant 1 : index
    %1 = memref.load %arg3[%c1] : memref<36xf32, #tpu.memory_space<smem>>
    %c2 = arith.constant 2 : index
    %2 = memref.load %arg3[%c2] : memref<36xf32, #tpu.memory_space<smem>>
    %c3 = arith.constant 3 : index
    %3 = memref.load %arg3[%c3] : memref<36xf32, #tpu.memory_space<smem>>
    %c4 = arith.constant 4 : index
    %4 = memref.load %arg3[%c4] : memref<36xf32, #tpu.memory_space<smem>>
    %c5 = arith.constant 5 : index
    %5 = memref.load %arg3[%c5] : memref<36xf32, #tpu.memory_space<smem>>
    %c6 = arith.constant 6 : index
    %6 = memref.load %arg3[%c6] : memref<36xf32, #tpu.memory_space<smem>>
    %c7 = arith.constant 7 : index
    %7 = memref.load %arg3[%c7] : memref<36xf32, #tpu.memory_space<smem>>
    %c8 = arith.constant 8 : index
    %8 = memref.load %arg3[%c8] : memref<36xf32, #tpu.memory_space<smem>>
    %c9 = arith.constant 9 : index
    %9 = memref.load %arg3[%c9] : memref<36xf32, #tpu.memory_space<smem>>
    %c10 = arith.constant 10 : index
    %10 = memref.load %arg3[%c10] : memref<36xf32, #tpu.memory_space<smem>>
    %c11 = arith.constant 11 : index
    %11 = memref.load %arg3[%c11] : memref<36xf32, #tpu.memory_space<smem>>
    %c12 = arith.constant 12 : index
    %12 = memref.load %arg3[%c12] : memref<36xf32, #tpu.memory_space<smem>>
    %c13 = arith.constant 13 : index
    %13 = memref.load %arg3[%c13] : memref<36xf32, #tpu.memory_space<smem>>
    %c14 = arith.constant 14 : index
    %14 = memref.load %arg3[%c14] : memref<36xf32, #tpu.memory_space<smem>>
    %c15 = arith.constant 15 : index
    %15 = memref.load %arg3[%c15] : memref<36xf32, #tpu.memory_space<smem>>
    %c16 = arith.constant 16 : index
    %16 = memref.load %arg3[%c16] : memref<36xf32, #tpu.memory_space<smem>>
    %c17 = arith.constant 17 : index
    %17 = memref.load %arg3[%c17] : memref<36xf32, #tpu.memory_space<smem>>
    %c18 = arith.constant 18 : index
    %18 = memref.load %arg3[%c18] : memref<36xf32, #tpu.memory_space<smem>>
    %c19 = arith.constant 19 : index
    %19 = memref.load %arg3[%c19] : memref<36xf32, #tpu.memory_space<smem>>
    %c20 = arith.constant 20 : index
    %20 = memref.load %arg3[%c20] : memref<36xf32, #tpu.memory_space<smem>>
    %c21 = arith.constant 21 : index
    %21 = memref.load %arg3[%c21] : memref<36xf32, #tpu.memory_space<smem>>
    %c22 = arith.constant 22 : index
    %22 = memref.load %arg3[%c22] : memref<36xf32, #tpu.memory_space<smem>>
    %c23 = arith.constant 23 : index
    %23 = memref.load %arg3[%c23] : memref<36xf32, #tpu.memory_space<smem>>
    %c24 = arith.constant 24 : index
    %24 = memref.load %arg3[%c24] : memref<36xf32, #tpu.memory_space<smem>>
    %c25 = arith.constant 25 : index
    %25 = memref.load %arg3[%c25] : memref<36xf32, #tpu.memory_space<smem>>
    %c26 = arith.constant 26 : index
    %26 = memref.load %arg3[%c26] : memref<36xf32, #tpu.memory_space<smem>>
    %c27 = arith.constant 27 : index
    %27 = memref.load %arg3[%c27] : memref<36xf32, #tpu.memory_space<smem>>
    %c28 = arith.constant 28 : index
    %28 = memref.load %arg3[%c28] : memref<36xf32, #tpu.memory_space<smem>>
    %c29 = arith.constant 29 : index
    %29 = memref.load %arg3[%c29] : memref<36xf32, #tpu.memory_space<smem>>
    %c30 = arith.constant 30 : index
    %30 = memref.load %arg3[%c30] : memref<36xf32, #tpu.memory_space<smem>>
    %c31 = arith.constant 31 : index
    %31 = memref.load %arg3[%c31] : memref<36xf32, #tpu.memory_space<smem>>
    %c32 = arith.constant 32 : index
    %32 = memref.load %arg3[%c32] : memref<36xf32, #tpu.memory_space<smem>>
    %c33 = arith.constant 33 : index
    %33 = memref.load %arg3[%c33] : memref<36xf32, #tpu.memory_space<smem>>
    %c34 = arith.constant 34 : index
    %34 = memref.load %arg3[%c34] : memref<36xf32, #tpu.memory_space<smem>>
    %c35 = arith.constant 35 : index
    %35 = memref.load %arg3[%c35] : memref<36xf32, #tpu.memory_space<smem>>
    %c0_0 = arith.constant 0 : index
    %c0_1 = arith.constant 0 : index
    %c0_2 = arith.constant 0 : index
    %36 = vector.load %arg1[%c0_0, %c0_1, %c0_2] : memref<1x18x38xi32, #tpu.memory_space<vmem>>, vector<1x18x38xi32>
    %37 = vector.shape_cast %36 : vector<1x18x38xi32> to vector<18x38xi32>
    %c0_i32 = arith.constant 0 : i32
    %38 = vector.broadcast %c0_i32 : i32 to vector<18x38xi32>
    %39 = arith.cmpi eq, %37, %38 : vector<18x38xi32>
    %40 = arith.extui %39 : vector<18x38xi1> to vector<18x38xi32>
    %41 = arith.sitofp %40 : vector<18x38xi32> to vector<18x38xf32>
    %c0_3 = arith.constant 0 : index
    %c0_4 = arith.constant 0 : index
    %c0_5 = arith.constant 0 : index
    %c0_6 = arith.constant 0 : index
    %42 = vector.load %arg5[%c0_3, %c0_4, %c0_5, %c0_6] : memref<1x4x18x38xf32, #tpu.memory_space<vmem>>, vector<1x1x18x38xf32>
    %43 = vector.shape_cast %42 : vector<1x1x18x38xf32> to vector<18x38xf32>
    %44 = vector.shape_cast %41 : vector<18x38xf32> to vector<1x1x18x38xf32>
    tpu.vector_store %arg5[%c0_3, %c0_4, %c0_5, %c0_6], %44 {strides = array<i32>} : memref<1x4x18x38xf32, #tpu.memory_space<vmem>>, vector<1x1x18x38xf32>,
    %c1_i32 = arith.constant 1 : i32
    %45 = vector.broadcast %c1_i32 : i32 to vector<18x38xi32>
    %46 = arith.cmpi eq, %37, %45 : vector<18x38xi32>
    %47 = arith.extui %46 : vector<18x38xi1> to vector<18x38xi32>
    %48 = arith.sitofp %47 : vector<18x38xi32> to vector<18x38xf32>
    %c0_7 = arith.constant 0 : index
    %c1_8 = arith.constant 1 : index
    %c0_9 = arith.constant 0 : index
    %c0_10 = arith.constant 0 : index
    %49 = vector.load %arg5[%c0_7, %c1_8, %c0_9, %c0_10] : memref<1x4x18x38xf32, #tpu.memory_space<vmem>>, vector<1x1x18x38xf32>
    %50 = vector.shape_cast %49 : vector<1x1x18x38xf32> to vector<18x38xf32>
    %51 = vector.shape_cast %48 : vector<18x38xf32> to vector<1x1x18x38xf32>
    tpu.vector_store %arg5[%c0_7, %c1_8, %c0_9, %c0_10], %51 {strides = array<i32>} : memref<1x4x18x38xf32, #tpu.memory_space<vmem>>, vector<1x1x18x38xf32>,
    %c2_i32 = arith.constant 2 : i32
    %52 = vector.broadcast %c2_i32 : i32 to vector<18x38xi32>
    %53 = arith.cmpi eq, %37, %52 : vector<18x38xi32>
    %54 = arith.extui %53 : vector<18x38xi1> to vector<18x38xi32>
    %55 = arith.sitofp %54 : vector<18x38xi32> to vector<18x38xf32>
    %c0_11 = arith.constant 0 : index
    %c2_12 = arith.constant 2 : index
    %c0_13 = arith.constant 0 : index
    %c0_14 = arith.constant 0 : index
    %56 = vector.load %arg5[%c0_11, %c2_12, %c0_13, %c0_14] : memref<1x4x18x38xf32, #tpu.memory_space<vmem>>, vector<1x1x18x38xf32>
    %57 = vector.shape_cast %56 : vector<1x1x18x38xf32> to vector<18x38xf32>
    %58 = vector.shape_cast %55 : vector<18x38xf32> to vector<1x1x18x38xf32>
    tpu.vector_store %arg5[%c0_11, %c2_12, %c0_13, %c0_14], %58 {strides = array<i32>} : memref<1x4x18x38xf32, #tpu.memory_space<vmem>>, vector<1x1x18x38xf32>,
    %c3_i32 = arith.constant 3 : i32
    %59 = vector.broadcast %c3_i32 : i32 to vector<18x38xi32>
    %60 = arith.cmpi eq, %37, %59 : vector<18x38xi32>
    %61 = arith.extui %60 : vector<18x38xi1> to vector<18x38xi32>
    %62 = arith.sitofp %61 : vector<18x38xi32> to vector<18x38xf32>
    %c0_15 = arith.constant 0 : index
    %c3_16 = arith.constant 3 : index
    %c0_17 = arith.constant 0 : index
    %c0_18 = arith.constant 0 : index
    %63 = vector.load %arg5[%c0_15, %c3_16, %c0_17, %c0_18] : memref<1x4x18x38xf32, #tpu.memory_space<vmem>>, vector<1x1x18x38xf32>
    %64 = vector.shape_cast %63 : vector<1x1x18x38xf32> to vector<18x38xf32>
    %65 = vector.shape_cast %62 : vector<18x38xf32> to vector<1x1x18x38xf32>
    tpu.vector_store %arg5[%c0_15, %c3_16, %c0_17, %c0_18], %65 {strides = array<i32>} : memref<1x4x18x38xf32, #tpu.memory_space<vmem>>, vector<1x1x18x38xf32>,
    %c0_19 = arith.constant 0 : index
    %c0_20 = arith.constant 0 : index
    %c0_21 = arith.constant 0 : index
    %c0_22 = arith.constant 0 : index
    %66 = vector.load %arg5[%c0_19, %c0_20, %c0_21, %c0_22] : memref<1x4x18x38xf32, #tpu.memory_space<vmem>>, vector<1x1x16x36xf32>
    %67 = vector.shape_cast %66 : vector<1x1x16x36xf32> to vector<16x36xf32>
    %68 = vector.broadcast %0 : f32 to vector<16x36xf32>
    %69 = arith.mulf %67, %68 : vector<16x36xf32>
    %c0_23 = arith.constant 0 : index
    %c1_24 = arith.constant 1 : index
    %c0_25 = arith.constant 0 : index
    %c0_26 = arith.constant 0 : index
    %70 = vector.load %arg5[%c0_23, %c1_24, %c0_25, %c0_26] : memref<1x4x18x38xf32, #tpu.memory_space<vmem>>, vector<1x1x16x36xf32>
    %71 = vector.shape_cast %70 : vector<1x1x16x36xf32> to vector<16x36xf32>
    %72 = vector.broadcast %9 : f32 to vector<16x36xf32>
    %73 = arith.mulf %71, %72 : vector<16x36xf32>
    %74 = arith.addf %69, %73 : vector<16x36xf32>
    %c0_27 = arith.constant 0 : index
    %c2_28 = arith.constant 2 : index
    %c0_29 = arith.constant 0 : index
    %c0_30 = arith.constant 0 : index
    %75 = vector.load %arg5[%c0_27, %c2_28, %c0_29, %c0_30] : memref<1x4x18x38xf32, #tpu.memory_space<vmem>>, vector<1x1x16x36xf32>
    %76 = vector.shape_cast %75 : vector<1x1x16x36xf32> to vector<16x36xf32>
    %77 = vector.broadcast %18 : f32 to vector<16x36xf32>
    %78 = arith.mulf %76, %77 : vector<16x36xf32>
    %79 = arith.addf %74, %78 : vector<16x36xf32>
    %c0_31 = arith.constant 0 : index
    %c3_32 = arith.constant 3 : index
    %c0_33 = arith.constant 0 : index
    %c0_34 = arith.constant 0 : index
    %80 = vector.load %arg5[%c0_31, %c3_32, %c0_33, %c0_34] : memref<1x4x18x38xf32, #tpu.memory_space<vmem>>, vector<1x1x16x36xf32>
    %81 = vector.shape_cast %80 : vector<1x1x16x36xf32> to vector<16x36xf32>
    %82 = vector.broadcast %27 : f32 to vector<16x36xf32>
    %83 = arith.mulf %81, %82 : vector<16x36xf32>
    %84 = arith.addf %79, %83 : vector<16x36xf32>
    %c0_35 = arith.constant 0 : index
    %c0_36 = arith.constant 0 : index
    %c0_37 = arith.constant 0 : index
    %85 = vector.load %arg7[%c0_35, %c0_36, %c0_37] : memref<9x16x36xf32, #tpu.memory_space<vmem>>, vector<1x16x36xf32>
    %86 = vector.shape_cast %85 : vector<1x16x36xf32> to vector<16x36xf32>
    %87 = vector.shape_cast %84 : vector<16x36xf32> to vector<1x16x36xf32>
    tpu.vector_store %arg7[%c0_35, %c0_36, %c0_37], %87 {strides = array<i32>} : memref<9x16x36xf32, #tpu.memory_space<vmem>>, vector<1x16x36xf32>,
    %c0_38 = arith.constant 0 : index
    %c0_39 = arith.constant 0 : index
    %c0_40 = arith.constant 0 : index
    %c1_41 = arith.constant 1 : index
    %88 = vector.load %arg5[%c0_38, %c0_39, %c0_40, %c1_41] : memref<1x4x18x38xf32, #tpu.memory_space<vmem>>, vector<1x1x16x36xf32>
    %89 = vector.shape_cast %88 : vector<1x1x16x36xf32> to vector<16x36xf32>
    %90 = vector.broadcast %1 : f32 to vector<16x36xf32>
    %91 = arith.mulf %89, %90 : vector<16x36xf32>
    %c0_42 = arith.constant 0 : index
    %c1_43 = arith.constant 1 : index
    %c0_44 = arith.constant 0 : index
    %c1_45 = arith.constant 1 : index
    %92 = vector.load %arg5[%c0_42, %c1_43, %c0_44, %c1_45] : memref<1x4x18x38xf32, #tpu.memory_space<vmem>>, vector<1x1x16x36xf32>
    %93 = vector.shape_cast %92 : vector<1x1x16x36xf32> to vector<16x36xf32>
    %94 = vector.broadcast %10 : f32 to vector<16x36xf32>
    %95 = arith.mulf %93, %94 : vector<16x36xf32>
    %96 = arith.addf %91, %95 : vector<16x36xf32>
    %c0_46 = arith.constant 0 : index
    %c2_47 = arith.constant 2 : index
    %c0_48 = arith.constant 0 : index
    %c1_49 = arith.constant 1 : index
    %97 = vector.load %arg5[%c0_46, %c2_47, %c0_48, %c1_49] : memref<1x4x18x38xf32, #tpu.memory_space<vmem>>, vector<1x1x16x36xf32>
    %98 = vector.shape_cast %97 : vector<1x1x16x36xf32> to vector<16x36xf32>
    %99 = vector.broadcast %19 : f32 to vector<16x36xf32>
    %100 = arith.mulf %98, %99 : vector<16x36xf32>
    %101 = arith.addf %96, %100 : vector<16x36xf32>
    %c0_50 = arith.constant 0 : index
    %c3_51 = arith.constant 3 : index
    %c0_52 = arith.constant 0 : index
    %c1_53 = arith.constant 1 : index
    %102 = vector.load %arg5[%c0_50, %c3_51, %c0_52, %c1_53] : memref<1x4x18x38xf32, #tpu.memory_space<vmem>>, vector<1x1x16x36xf32>
    %103 = vector.shape_cast %102 : vector<1x1x16x36xf32> to vector<16x36xf32>
    %104 = vector.broadcast %28 : f32 to vector<16x36xf32>
    %105 = arith.mulf %103, %104 : vector<16x36xf32>
    %106 = arith.addf %101, %105 : vector<16x36xf32>
    %c1_54 = arith.constant 1 : index
    %c0_55 = arith.constant 0 : index
    %c0_56 = arith.constant 0 : index
    %107 = vector.load %arg7[%c1_54, %c0_55, %c0_56] : memref<9x16x36xf32, #tpu.memory_space<vmem>>, vector<1x16x36xf32>
    %108 = vector.shape_cast %107 : vector<1x16x36xf32> to vector<16x36xf32>
    %109 = vector.shape_cast %106 : vector<16x36xf32> to vector<1x16x36xf32>
    tpu.vector_store %arg7[%c1_54, %c0_55, %c0_56], %109 {strides = array<i32>} : memref<9x16x36xf32, #tpu.memory_space<vmem>>, vector<1x16x36xf32>,
    %110 = arith.addf %84, %106 : vector<16x36xf32>
    %c0_57 = arith.constant 0 : index
    %c0_58 = arith.constant 0 : index
    %c0_59 = arith.constant 0 : index
    %c2_60 = arith.constant 2 : index
    %111 = vector.load %arg5[%c0_57, %c0_58, %c0_59, %c2_60] : memref<1x4x18x38xf32, #tpu.memory_space<vmem>>, vector<1x1x16x36xf32>
    %112 = vector.shape_cast %111 : vector<1x1x16x36xf32> to vector<16x36xf32>
    %113 = vector.broadcast %2 : f32 to vector<16x36xf32>
    %114 = arith.mulf %112, %113 : vector<16x36xf32>
    %c0_61 = arith.constant 0 : index
    %c1_62 = arith.constant 1 : index
    %c0_63 = arith.constant 0 : index
    %c2_64 = arith.constant 2 : index
    %115 = vector.load %arg5[%c0_61, %c1_62, %c0_63, %c2_64] : memref<1x4x18x38xf32, #tpu.memory_space<vmem>>, vector<1x1x16x36xf32>
    %116 = vector.shape_cast %115 : vector<1x1x16x36xf32> to vector<16x36xf32>
    %117 = vector.broadcast %11 : f32 to vector<16x36xf32>
    %118 = arith.mulf %116, %117 : vector<16x36xf32>
    %119 = arith.addf %114, %118 : vector<16x36xf32>
    %c0_65 = arith.constant 0 : index
    %c2_66 = arith.constant 2 : index
    %c0_67 = arith.constant 0 : index
    %c2_68 = arith.constant 2 : index
    %120 = vector.load %arg5[%c0_65, %c2_66, %c0_67, %c2_68] : memref<1x4x18x38xf32, #tpu.memory_space<vmem>>, vector<1x1x16x36xf32>
    %121 = vector.shape_cast %120 : vector<1x1x16x36xf32> to vector<16x36xf32>
    %122 = vector.broadcast %20 : f32 to vector<16x36xf32>
    %123 = arith.mulf %121, %122 : vector<16x36xf32>
    %124 = arith.addf %119, %123 : vector<16x36xf32>
    %c0_69 = arith.constant 0 : index
    %c3_70 = arith.constant 3 : index
    %c0_71 = arith.constant 0 : index
    %c2_72 = arith.constant 2 : index
    %125 = vector.load %arg5[%c0_69, %c3_70, %c0_71, %c2_72] : memref<1x4x18x38xf32, #tpu.memory_space<vmem>>, vector<1x1x16x36xf32>
    %126 = vector.shape_cast %125 : vector<1x1x16x36xf32> to vector<16x36xf32>
    %127 = vector.broadcast %29 : f32 to vector<16x36xf32>
    %128 = arith.mulf %126, %127 : vector<16x36xf32>
    %129 = arith.addf %124, %128 : vector<16x36xf32>
    %c2_73 = arith.constant 2 : index
    %c0_74 = arith.constant 0 : index
    %c0_75 = arith.constant 0 : index
    %130 = vector.load %arg7[%c2_73, %c0_74, %c0_75] : memref<9x16x36xf32, #tpu.memory_space<vmem>>, vector<1x16x36xf32>
    %131 = vector.shape_cast %130 : vector<1x16x36xf32> to vector<16x36xf32>
    %132 = vector.shape_cast %129 : vector<16x36xf32> to vector<1x16x36xf32>
    tpu.vector_store %arg7[%c2_73, %c0_74, %c0_75], %132 {strides = array<i32>} : memref<9x16x36xf32, #tpu.memory_space<vmem>>, vector<1x16x36xf32>,
    %133 = arith.addf %110, %129 : vector<16x36xf32>
    %c0_76 = arith.constant 0 : index
    %c0_77 = arith.constant 0 : index
    %c1_78 = arith.constant 1 : index
    %c0_79 = arith.constant 0 : index
    %134 = vector.load %arg5[%c0_76, %c0_77, %c1_78, %c0_79] : memref<1x4x18x38xf32, #tpu.memory_space<vmem>>, vector<1x1x16x36xf32>
    %135 = vector.shape_cast %134 : vector<1x1x16x36xf32> to vector<16x36xf32>
    %136 = vector.broadcast %3 : f32 to vector<16x36xf32>
    %137 = arith.mulf %135, %136 : vector<16x36xf32>
    %c0_80 = arith.constant 0 : index
    %c1_81 = arith.constant 1 : index
    %c1_82 = arith.constant 1 : index
    %c0_83 = arith.constant 0 : index
    %138 = vector.load %arg5[%c0_80, %c1_81, %c1_82, %c0_83] : memref<1x4x18x38xf32, #tpu.memory_space<vmem>>, vector<1x1x16x36xf32>
    %139 = vector.shape_cast %138 : vector<1x1x16x36xf32> to vector<16x36xf32>
    %140 = vector.broadcast %12 : f32 to vector<16x36xf32>
    %141 = arith.mulf %139, %140 : vector<16x36xf32>
    %142 = arith.addf %137, %141 : vector<16x36xf32>
    %c0_84 = arith.constant 0 : index
    %c2_85 = arith.constant 2 : index
    %c1_86 = arith.constant 1 : index
    %c0_87 = arith.constant 0 : index
    %143 = vector.load %arg5[%c0_84, %c2_85, %c1_86, %c0_87] : memref<1x4x18x38xf32, #tpu.memory_space<vmem>>, vector<1x1x16x36xf32>
    %144 = vector.shape_cast %143 : vector<1x1x16x36xf32> to vector<16x36xf32>
    %145 = vector.broadcast %21 : f32 to vector<16x36xf32>
    %146 = arith.mulf %144, %145 : vector<16x36xf32>
    %147 = arith.addf %142, %146 : vector<16x36xf32>
    %c0_88 = arith.constant 0 : index
    %c3_89 = arith.constant 3 : index
    %c1_90 = arith.constant 1 : index
    %c0_91 = arith.constant 0 : index
    %148 = vector.load %arg5[%c0_88, %c3_89, %c1_90, %c0_91] : memref<1x4x18x38xf32, #tpu.memory_space<vmem>>, vector<1x1x16x36xf32>
    %149 = vector.shape_cast %148 : vector<1x1x16x36xf32> to vector<16x36xf32>
    %150 = vector.broadcast %30 : f32 to vector<16x36xf32>
    %151 = arith.mulf %149, %150 : vector<16x36xf32>
    %152 = arith.addf %147, %151 : vector<16x36xf32>
    %c3_92 = arith.constant 3 : index
    %c0_93 = arith.constant 0 : index
    %c0_94 = arith.constant 0 : index
    %153 = vector.load %arg7[%c3_92, %c0_93, %c0_94] : memref<9x16x36xf32, #tpu.memory_space<vmem>>, vector<1x16x36xf32>
    %154 = vector.shape_cast %153 : vector<1x16x36xf32> to vector<16x36xf32>
    %155 = vector.shape_cast %152 : vector<16x36xf32> to vector<1x16x36xf32>
    tpu.vector_store %arg7[%c3_92, %c0_93, %c0_94], %155 {strides = array<i32>} : memref<9x16x36xf32, #tpu.memory_space<vmem>>, vector<1x16x36xf32>,
    %156 = arith.addf %133, %152 : vector<16x36xf32>
    %c0_95 = arith.constant 0 : index
    %c0_96 = arith.constant 0 : index
    %c1_97 = arith.constant 1 : index
    %c1_98 = arith.constant 1 : index
    %157 = vector.load %arg5[%c0_95, %c0_96, %c1_97, %c1_98] : memref<1x4x18x38xf32, #tpu.memory_space<vmem>>, vector<1x1x16x36xf32>
    %158 = vector.shape_cast %157 : vector<1x1x16x36xf32> to vector<16x36xf32>
    %159 = vector.broadcast %4 : f32 to vector<16x36xf32>
    %160 = arith.mulf %158, %159 : vector<16x36xf32>
    %c0_99 = arith.constant 0 : index
    %c1_100 = arith.constant 1 : index
    %c1_101 = arith.constant 1 : index
    %c1_102 = arith.constant 1 : index
    %161 = vector.load %arg5[%c0_99, %c1_100, %c1_101, %c1_102] : memref<1x4x18x38xf32, #tpu.memory_space<vmem>>, vector<1x1x16x36xf32>
    %162 = vector.shape_cast %161 : vector<1x1x16x36xf32> to vector<16x36xf32>
    %163 = vector.broadcast %13 : f32 to vector<16x36xf32>
    %164 = arith.mulf %162, %163 : vector<16x36xf32>
    %165 = arith.addf %160, %164 : vector<16x36xf32>
    %c0_103 = arith.constant 0 : index
    %c2_104 = arith.constant 2 : index
    %c1_105 = arith.constant 1 : index
    %c1_106 = arith.constant 1 : index
    %166 = vector.load %arg5[%c0_103, %c2_104, %c1_105, %c1_106] : memref<1x4x18x38xf32, #tpu.memory_space<vmem>>, vector<1x1x16x36xf32>
    %167 = vector.shape_cast %166 : vector<1x1x16x36xf32> to vector<16x36xf32>
    %168 = vector.broadcast %22 : f32 to vector<16x36xf32>
    %169 = arith.mulf %167, %168 : vector<16x36xf32>
    %170 = arith.addf %165, %169 : vector<16x36xf32>
    %c0_107 = arith.constant 0 : index
    %c3_108 = arith.constant 3 : index
    %c1_109 = arith.constant 1 : index
    %c1_110 = arith.constant 1 : index
    %171 = vector.load %arg5[%c0_107, %c3_108, %c1_109, %c1_110] : memref<1x4x18x38xf32, #tpu.memory_space<vmem>>, vector<1x1x16x36xf32>
    %172 = vector.shape_cast %171 : vector<1x1x16x36xf32> to vector<16x36xf32>
    %173 = vector.broadcast %31 : f32 to vector<16x36xf32>
    %174 = arith.mulf %172, %173 : vector<16x36xf32>
    %175 = arith.addf %170, %174 : vector<16x36xf32>
    %c4_111 = arith.constant 4 : index
    %c0_112 = arith.constant 0 : index
    %c0_113 = arith.constant 0 : index
    %176 = vector.load %arg7[%c4_111, %c0_112, %c0_113] : memref<9x16x36xf32, #tpu.memory_space<vmem>>, vector<1x16x36xf32>
    %177 = vector.shape_cast %176 : vector<1x16x36xf32> to vector<16x36xf32>
    %178 = vector.shape_cast %175 : vector<16x36xf32> to vector<1x16x36xf32>
    tpu.vector_store %arg7[%c4_111, %c0_112, %c0_113], %178 {strides = array<i32>} : memref<9x16x36xf32, #tpu.memory_space<vmem>>, vector<1x16x36xf32>,
    %179 = arith.addf %156, %175 : vector<16x36xf32>
    %c0_114 = arith.constant 0 : index
    %c0_115 = arith.constant 0 : index
    %c1_116 = arith.constant 1 : index
    %c2_117 = arith.constant 2 : index
    %180 = vector.load %arg5[%c0_114, %c0_115, %c1_116, %c2_117] : memref<1x4x18x38xf32, #tpu.memory_space<vmem>>, vector<1x1x16x36xf32>
    %181 = vector.shape_cast %180 : vector<1x1x16x36xf32> to vector<16x36xf32>
    %182 = vector.broadcast %5 : f32 to vector<16x36xf32>
    %183 = arith.mulf %181, %182 : vector<16x36xf32>
    %c0_118 = arith.constant 0 : index
    %c1_119 = arith.constant 1 : index
    %c1_120 = arith.constant 1 : index
    %c2_121 = arith.constant 2 : index
    %184 = vector.load %arg5[%c0_118, %c1_119, %c1_120, %c2_121] : memref<1x4x18x38xf32, #tpu.memory_space<vmem>>, vector<1x1x16x36xf32>
    %185 = vector.shape_cast %184 : vector<1x1x16x36xf32> to vector<16x36xf32>
    %186 = vector.broadcast %14 : f32 to vector<16x36xf32>
    %187 = arith.mulf %185, %186 : vector<16x36xf32>
    %188 = arith.addf %183, %187 : vector<16x36xf32>
    %c0_122 = arith.constant 0 : index
    %c2_123 = arith.constant 2 : index
    %c1_124 = arith.constant 1 : index
    %c2_125 = arith.constant 2 : index
    %189 = vector.load %arg5[%c0_122, %c2_123, %c1_124, %c2_125] : memref<1x4x18x38xf32, #tpu.memory_space<vmem>>, vector<1x1x16x36xf32>
    %190 = vector.shape_cast %189 : vector<1x1x16x36xf32> to vector<16x36xf32>
    %191 = vector.broadcast %23 : f32 to vector<16x36xf32>
    %192 = arith.mulf %190, %191 : vector<16x36xf32>
    %193 = arith.addf %188, %192 : vector<16x36xf32>
    %c0_126 = arith.constant 0 : index
    %c3_127 = arith.constant 3 : index
    %c1_128 = arith.constant 1 : index
    %c2_129 = arith.constant 2 : index
    %194 = vector.load %arg5[%c0_126, %c3_127, %c1_128, %c2_129] : memref<1x4x18x38xf32, #tpu.memory_space<vmem>>, vector<1x1x16x36xf32>
    %195 = vector.shape_cast %194 : vector<1x1x16x36xf32> to vector<16x36xf32>
    %196 = vector.broadcast %32 : f32 to vector<16x36xf32>
    %197 = arith.mulf %195, %196 : vector<16x36xf32>
    %198 = arith.addf %193, %197 : vector<16x36xf32>
    %c5_130 = arith.constant 5 : index
    %c0_131 = arith.constant 0 : index
    %c0_132 = arith.constant 0 : index
    %199 = vector.load %arg7[%c5_130, %c0_131, %c0_132] : memref<9x16x36xf32, #tpu.memory_space<vmem>>, vector<1x16x36xf32>
    %200 = vector.shape_cast %199 : vector<1x16x36xf32> to vector<16x36xf32>
    %201 = vector.shape_cast %198 : vector<16x36xf32> to vector<1x16x36xf32>
    tpu.vector_store %arg7[%c5_130, %c0_131, %c0_132], %201 {strides = array<i32>} : memref<9x16x36xf32, #tpu.memory_space<vmem>>, vector<1x16x36xf32>,
    %202 = arith.addf %179, %198 : vector<16x36xf32>
    %c0_133 = arith.constant 0 : index
    %c0_134 = arith.constant 0 : index
    %c2_135 = arith.constant 2 : index
    %c0_136 = arith.constant 0 : index
    %203 = vector.load %arg5[%c0_133, %c0_134, %c2_135, %c0_136] : memref<1x4x18x38xf32, #tpu.memory_space<vmem>>, vector<1x1x16x36xf32>
    %204 = vector.shape_cast %203 : vector<1x1x16x36xf32> to vector<16x36xf32>
    %205 = vector.broadcast %6 : f32 to vector<16x36xf32>
    %206 = arith.mulf %204, %205 : vector<16x36xf32>
    %c0_137 = arith.constant 0 : index
    %c1_138 = arith.constant 1 : index
    %c2_139 = arith.constant 2 : index
    %c0_140 = arith.constant 0 : index
    %207 = vector.load %arg5[%c0_137, %c1_138, %c2_139, %c0_140] : memref<1x4x18x38xf32, #tpu.memory_space<vmem>>, vector<1x1x16x36xf32>
    %208 = vector.shape_cast %207 : vector<1x1x16x36xf32> to vector<16x36xf32>
    %209 = vector.broadcast %15 : f32 to vector<16x36xf32>
    %210 = arith.mulf %208, %209 : vector<16x36xf32>
    %211 = arith.addf %206, %210 : vector<16x36xf32>
    %c0_141 = arith.constant 0 : index
    %c2_142 = arith.constant 2 : index
    %c2_143 = arith.constant 2 : index
    %c0_144 = arith.constant 0 : index
    %212 = vector.load %arg5[%c0_141, %c2_142, %c2_143, %c0_144] : memref<1x4x18x38xf32, #tpu.memory_space<vmem>>, vector<1x1x16x36xf32>
    %213 = vector.shape_cast %212 : vector<1x1x16x36xf32> to vector<16x36xf32>
    %214 = vector.broadcast %24 : f32 to vector<16x36xf32>
    %215 = arith.mulf %213, %214 : vector<16x36xf32>
    %216 = arith.addf %211, %215 : vector<16x36xf32>
    %c0_145 = arith.constant 0 : index
    %c3_146 = arith.constant 3 : index
    %c2_147 = arith.constant 2 : index
    %c0_148 = arith.constant 0 : index
    %217 = vector.load %arg5[%c0_145, %c3_146, %c2_147, %c0_148] : memref<1x4x18x38xf32, #tpu.memory_space<vmem>>, vector<1x1x16x36xf32>
    %218 = vector.shape_cast %217 : vector<1x1x16x36xf32> to vector<16x36xf32>
    %219 = vector.broadcast %33 : f32 to vector<16x36xf32>
    %220 = arith.mulf %218, %219 : vector<16x36xf32>
    %221 = arith.addf %216, %220 : vector<16x36xf32>
    %c6_149 = arith.constant 6 : index
    %c0_150 = arith.constant 0 : index
    %c0_151 = arith.constant 0 : index
    %222 = vector.load %arg7[%c6_149, %c0_150, %c0_151] : memref<9x16x36xf32, #tpu.memory_space<vmem>>, vector<1x16x36xf32>
    %223 = vector.shape_cast %222 : vector<1x16x36xf32> to vector<16x36xf32>
    %224 = vector.shape_cast %221 : vector<16x36xf32> to vector<1x16x36xf32>
    tpu.vector_store %arg7[%c6_149, %c0_150, %c0_151], %224 {strides = array<i32>} : memref<9x16x36xf32, #tpu.memory_space<vmem>>, vector<1x16x36xf32>,
    %225 = arith.addf %202, %221 : vector<16x36xf32>
    %c0_152 = arith.constant 0 : index
    %c0_153 = arith.constant 0 : index
    %c2_154 = arith.constant 2 : index
    %c1_155 = arith.constant 1 : index
    %226 = vector.load %arg5[%c0_152, %c0_153, %c2_154, %c1_155] : memref<1x4x18x38xf32, #tpu.memory_space<vmem>>, vector<1x1x16x36xf32>
    %227 = vector.shape_cast %226 : vector<1x1x16x36xf32> to vector<16x36xf32>
    %228 = vector.broadcast %7 : f32 to vector<16x36xf32>
    %229 = arith.mulf %227, %228 : vector<16x36xf32>
    %c0_156 = arith.constant 0 : index
    %c1_157 = arith.constant 1 : index
    %c2_158 = arith.constant 2 : index
    %c1_159 = arith.constant 1 : index
    %230 = vector.load %arg5[%c0_156, %c1_157, %c2_158, %c1_159] : memref<1x4x18x38xf32, #tpu.memory_space<vmem>>, vector<1x1x16x36xf32>
    %231 = vector.shape_cast %230 : vector<1x1x16x36xf32> to vector<16x36xf32>
    %232 = vector.broadcast %16 : f32 to vector<16x36xf32>
    %233 = arith.mulf %231, %232 : vector<16x36xf32>
    %234 = arith.addf %229, %233 : vector<16x36xf32>
    %c0_160 = arith.constant 0 : index
    %c2_161 = arith.constant 2 : index
    %c2_162 = arith.constant 2 : index
    %c1_163 = arith.constant 1 : index
    %235 = vector.load %arg5[%c0_160, %c2_161, %c2_162, %c1_163] : memref<1x4x18x38xf32, #tpu.memory_space<vmem>>, vector<1x1x16x36xf32>
    %236 = vector.shape_cast %235 : vector<1x1x16x36xf32> to vector<16x36xf32>
    %237 = vector.broadcast %25 : f32 to vector<16x36xf32>
    %238 = arith.mulf %236, %237 : vector<16x36xf32>
    %239 = arith.addf %234, %238 : vector<16x36xf32>
    %c0_164 = arith.constant 0 : index
    %c3_165 = arith.constant 3 : index
    %c2_166 = arith.constant 2 : index
    %c1_167 = arith.constant 1 : index
    %240 = vector.load %arg5[%c0_164, %c3_165, %c2_166, %c1_167] : memref<1x4x18x38xf32, #tpu.memory_space<vmem>>, vector<1x1x16x36xf32>
    %241 = vector.shape_cast %240 : vector<1x1x16x36xf32> to vector<16x36xf32>
    %242 = vector.broadcast %34 : f32 to vector<16x36xf32>
    %243 = arith.mulf %241, %242 : vector<16x36xf32>
    %244 = arith.addf %239, %243 : vector<16x36xf32>
    %c7_168 = arith.constant 7 : index
    %c0_169 = arith.constant 0 : index
    %c0_170 = arith.constant 0 : index
    %245 = vector.load %arg7[%c7_168, %c0_169, %c0_170] : memref<9x16x36xf32, #tpu.memory_space<vmem>>, vector<1x16x36xf32>
    %246 = vector.shape_cast %245 : vector<1x16x36xf32> to vector<16x36xf32>
    %247 = vector.shape_cast %244 : vector<16x36xf32> to vector<1x16x36xf32>
    tpu.vector_store %arg7[%c7_168, %c0_169, %c0_170], %247 {strides = array<i32>} : memref<9x16x36xf32, #tpu.memory_space<vmem>>, vector<1x16x36xf32>,
    %248 = arith.addf %225, %244 : vector<16x36xf32>
    %c0_171 = arith.constant 0 : index
    %c0_172 = arith.constant 0 : index
    %c2_173 = arith.constant 2 : index
    %c2_174 = arith.constant 2 : index
    %249 = vector.load %arg5[%c0_171, %c0_172, %c2_173, %c2_174] : memref<1x4x18x38xf32, #tpu.memory_space<vmem>>, vector<1x1x16x36xf32>
    %250 = vector.shape_cast %249 : vector<1x1x16x36xf32> to vector<16x36xf32>
    %251 = vector.broadcast %8 : f32 to vector<16x36xf32>
    %252 = arith.mulf %250, %251 : vector<16x36xf32>
    %c0_175 = arith.constant 0 : index
    %c1_176 = arith.constant 1 : index
    %c2_177 = arith.constant 2 : index
    %c2_178 = arith.constant 2 : index
    %253 = vector.load %arg5[%c0_175, %c1_176, %c2_177, %c2_178] : memref<1x4x18x38xf32, #tpu.memory_space<vmem>>, vector<1x1x16x36xf32>
    %254 = vector.shape_cast %253 : vector<1x1x16x36xf32> to vector<16x36xf32>
    %255 = vector.broadcast %17 : f32 to vector<16x36xf32>
    %256 = arith.mulf %254, %255 : vector<16x36xf32>
    %257 = arith.addf %252, %256 : vector<16x36xf32>
    %c0_179 = arith.constant 0 : index
    %c2_180 = arith.constant 2 : index
    %c2_181 = arith.constant 2 : index
    %c2_182 = arith.constant 2 : index
    %258 = vector.load %arg5[%c0_179, %c2_180, %c2_181, %c2_182] : memref<1x4x18x38xf32, #tpu.memory_space<vmem>>, vector<1x1x16x36xf32>
    %259 = vector.shape_cast %258 : vector<1x1x16x36xf32> to vector<16x36xf32>
    %260 = vector.broadcast %26 : f32 to vector<16x36xf32>
    %261 = arith.mulf %259, %260 : vector<16x36xf32>
    %262 = arith.addf %257, %261 : vector<16x36xf32>
    %c0_183 = arith.constant 0 : index
    %c3_184 = arith.constant 3 : index
    %c2_185 = arith.constant 2 : index
    %c2_186 = arith.constant 2 : index
    %263 = vector.load %arg5[%c0_183, %c3_184, %c2_185, %c2_186] : memref<1x4x18x38xf32, #tpu.memory_space<vmem>>, vector<1x1x16x36xf32>
    %264 = vector.shape_cast %263 : vector<1x1x16x36xf32> to vector<16x36xf32>
    %265 = vector.broadcast %35 : f32 to vector<16x36xf32>
    %266 = arith.mulf %264, %265 : vector<16x36xf32>
    %267 = arith.addf %262, %266 : vector<16x36xf32>
    %c8_187 = arith.constant 8 : index
    %c0_188 = arith.constant 0 : index
    %c0_189 = arith.constant 0 : index
    %268 = vector.load %arg7[%c8_187, %c0_188, %c0_189] : memref<9x16x36xf32, #tpu.memory_space<vmem>>, vector<1x16x36xf32>
    %269 = vector.shape_cast %268 : vector<1x16x36xf32> to vector<16x36xf32>
    %270 = vector.shape_cast %267 : vector<16x36xf32> to vector<1x16x36xf32>
    tpu.vector_store %arg7[%c8_187, %c0_188, %c0_189], %270 {strides = array<i32>} : memref<9x16x36xf32, #tpu.memory_space<vmem>>, vector<1x16x36xf32>,
    %271 = arith.addf %248, %267 : vector<16x36xf32>
    %cst = arith.constant 1.000000e+00 : f32
    %272 = vector.broadcast %cst : f32 to vector<16x36xf32>
    %273 = arith.subf %271, %272 : vector<16x36xf32>
    %cst_190 = arith.constant 0.000000e+00 : f32
    %cst_191 = arith.constant 1.000000e+00 : f32
    %274 = vector.broadcast %cst_190 : f32 to vector<16x36xf32>
    %275 = arith.maximumf %274, %273 : vector<16x36xf32>
    %276 = vector.broadcast %cst_191 : f32 to vector<16x36xf32>
    %277 = arith.minimumf %276, %275 : vector<16x36xf32>
    %cst_192 = arith.constant 1.000000e+00 : f32
    %278 = vector.broadcast %cst_192 : f32 to vector<16x36xf32>
    %279 = arith.subf %278, %277 : vector<16x36xf32>
    %c0_193 = arith.constant 0 : index
    %c0_194 = arith.constant 0 : index
    %c0_195 = arith.constant 0 : index
    %c0_196 = arith.constant 0 : index
    %280 = vector.load %arg6[%c0_193, %c0_194, %c0_195, %c0_196] : memref<1x1x16x36xf32, #tpu.memory_space<vmem>>, vector<1x1x16x36xf32>
    %281 = vector.shape_cast %280 : vector<1x1x16x36xf32> to vector<16x36xf32>
    %282 = vector.shape_cast %277 : vector<16x36xf32> to vector<1x1x16x36xf32>
    tpu.vector_store %arg6[%c0_193, %c0_194, %c0_195, %c0_196], %282 {strides = array<i32>} : memref<1x1x16x36xf32, #tpu.memory_space<vmem>>, vector<1x1x16x36xf32>,
    %cst_197 = arith.constant 0.000000e+00 : f32
    %283 = vector.broadcast %cst_197 : f32 to vector<18x38xf32>
    %c0_198 = arith.constant 0 : index
    %c0_199 = arith.constant 0 : index
    %284 = vector.load %arg8[%c0_198, %c0_199] : memref<18x38xf32, #tpu.memory_space<vmem>>, vector<18x38xf32>
    tpu.vector_store %arg8[%c0_198, %c0_199], %283 {strides = array<i32>} : memref<18x38xf32, #tpu.memory_space<vmem>>, vector<18x38xf32>,
    %c1_200 = arith.constant 1 : index
    %c1_201 = arith.constant 1 : index
    %285 = vector.load %arg8[%c1_200, %c1_201] : memref<18x38xf32, #tpu.memory_space<vmem>>, vector<16x36xf32>
    tpu.vector_store %arg8[%c1_200, %c1_201], %279 {strides = array<i32>} : memref<18x38xf32, #tpu.memory_space<vmem>>, vector<16x36xf32>,
    %c0_202 = arith.constant 0 : index
    %c0_203 = arith.constant 0 : index
    %286 = vector.load %arg8[%c0_202, %c0_203] : memref<18x38xf32, #tpu.memory_space<vmem>>, vector<16x36xf32>
    %c0_204 = arith.constant 0 : index
    %c0_205 = arith.constant 0 : index
    %c0_206 = arith.constant 0 : index
    %287 = vector.load %arg7[%c0_204, %c0_205, %c0_206] : memref<9x16x36xf32, #tpu.memory_space<vmem>>, vector<1x16x36xf32>
    %288 = vector.shape_cast %287 : vector<1x16x36xf32> to vector<16x36xf32>
    %289 = arith.mulf %286, %288 : vector<16x36xf32>
    %c0_207 = arith.constant 0 : index
    %c0_208 = arith.constant 0 : index
    %c0_209 = arith.constant 0 : index
    %290 = vector.load %arg7[%c0_207, %c0_208, %c0_209] : memref<9x16x36xf32, #tpu.memory_space<vmem>>, vector<1x16x36xf32>
    %291 = vector.shape_cast %290 : vector<1x16x36xf32> to vector<16x36xf32>
    %292 = vector.shape_cast %289 : vector<16x36xf32> to vector<1x16x36xf32>
    tpu.vector_store %arg7[%c0_207, %c0_208, %c0_209], %292 {strides = array<i32>} : memref<9x16x36xf32, #tpu.memory_space<vmem>>, vector<1x16x36xf32>,
    %c0_210 = arith.constant 0 : index
    %c0_211 = arith.constant 0 : index
    %c0_212 = arith.constant 0 : index
    %c0_213 = arith.constant 0 : index
    %293 = vector.load %arg2[%c0_210, %c0_211, %c0_212, %c0_213] : memref<1x3x18x38xf32, #tpu.memory_space<vmem>>, vector<1x1x16x36xf32>
    %294 = vector.shape_cast %293 : vector<1x1x16x36xf32> to vector<16x36xf32>
    %295 = arith.mulf %294, %289 : vector<16x36xf32>
    %c0_214 = arith.constant 0 : index
    %c1_215 = arith.constant 1 : index
    %296 = vector.load %arg8[%c0_214, %c1_215] : memref<18x38xf32, #tpu.memory_space<vmem>>, vector<16x36xf32>
    %c1_216 = arith.constant 1 : index
    %c0_217 = arith.constant 0 : index
    %c0_218 = arith.constant 0 : index
    %297 = vector.load %arg7[%c1_216, %c0_217, %c0_218] : memref<9x16x36xf32, #tpu.memory_space<vmem>>, vector<1x16x36xf32>
    %298 = vector.shape_cast %297 : vector<1x16x36xf32> to vector<16x36xf32>
    %299 = arith.mulf %296, %298 : vector<16x36xf32>
    %c1_219 = arith.constant 1 : index
    %c0_220 = arith.constant 0 : index
    %c0_221 = arith.constant 0 : index
    %300 = vector.load %arg7[%c1_219, %c0_220, %c0_221] : memref<9x16x36xf32, #tpu.memory_space<vmem>>, vector<1x16x36xf32>
    %301 = vector.shape_cast %300 : vector<1x16x36xf32> to vector<16x36xf32>
    %302 = vector.shape_cast %299 : vector<16x36xf32> to vector<1x16x36xf32>
    tpu.vector_store %arg7[%c1_219, %c0_220, %c0_221], %302 {strides = array<i32>} : memref<9x16x36xf32, #tpu.memory_space<vmem>>, vector<1x16x36xf32>,
    %c0_222 = arith.constant 0 : index
    %c0_223 = arith.constant 0 : index
    %c0_224 = arith.constant 0 : index
    %c1_225 = arith.constant 1 : index
    %303 = vector.load %arg2[%c0_222, %c0_223, %c0_224, %c1_225] : memref<1x3x18x38xf32, #tpu.memory_space<vmem>>, vector<1x1x16x36xf32>
    %304 = vector.shape_cast %303 : vector<1x1x16x36xf32> to vector<16x36xf32>
    %305 = arith.mulf %304, %299 : vector<16x36xf32>
    %306 = arith.addf %295, %305 : vector<16x36xf32>
    %c0_226 = arith.constant 0 : index
    %c2_227 = arith.constant 2 : index
    %307 = vector.load %arg8[%c0_226, %c2_227] : memref<18x38xf32, #tpu.memory_space<vmem>>, vector<16x36xf32>
    %c2_228 = arith.constant 2 : index
    %c0_229 = arith.constant 0 : index
    %c0_230 = arith.constant 0 : index
    %308 = vector.load %arg7[%c2_228, %c0_229, %c0_230] : memref<9x16x36xf32, #tpu.memory_space<vmem>>, vector<1x16x36xf32>
    %309 = vector.shape_cast %308 : vector<1x16x36xf32> to vector<16x36xf32>
    %310 = arith.mulf %307, %309 : vector<16x36xf32>
    %c2_231 = arith.constant 2 : index
    %c0_232 = arith.constant 0 : index
    %c0_233 = arith.constant 0 : index
    %311 = vector.load %arg7[%c2_231, %c0_232, %c0_233] : memref<9x16x36xf32, #tpu.memory_space<vmem>>, vector<1x16x36xf32>
    %312 = vector.shape_cast %311 : vector<1x16x36xf32> to vector<16x36xf32>
    %313 = vector.shape_cast %310 : vector<16x36xf32> to vector<1x16x36xf32>
    tpu.vector_store %arg7[%c2_231, %c0_232, %c0_233], %313 {strides = array<i32>} : memref<9x16x36xf32, #tpu.memory_space<vmem>>, vector<1x16x36xf32>,
    %c0_234 = arith.constant 0 : index
    %c0_235 = arith.constant 0 : index
    %c0_236 = arith.constant 0 : index
    %c2_237 = arith.constant 2 : index
    %314 = vector.load %arg2[%c0_234, %c0_235, %c0_236, %c2_237] : memref<1x3x18x38xf32, #tpu.memory_space<vmem>>, vector<1x1x16x36xf32>
    %315 = vector.shape_cast %314 : vector<1x1x16x36xf32> to vector<16x36xf32>
    %316 = arith.mulf %315, %310 : vector<16x36xf32>
    %317 = arith.addf %306, %316 : vector<16x36xf32>
    %c1_238 = arith.constant 1 : index
    %c0_239 = arith.constant 0 : index
    %318 = vector.load %arg8[%c1_238, %c0_239] : memref<18x38xf32, #tpu.memory_space<vmem>>, vector<16x36xf32>
    %c3_240 = arith.constant 3 : index
    %c0_241 = arith.constant 0 : index
    %c0_242 = arith.constant 0 : index
    %319 = vector.load %arg7[%c3_240, %c0_241, %c0_242] : memref<9x16x36xf32, #tpu.memory_space<vmem>>, vector<1x16x36xf32>
    %320 = vector.shape_cast %319 : vector<1x16x36xf32> to vector<16x36xf32>
    %321 = arith.mulf %318, %320 : vector<16x36xf32>
    %c3_243 = arith.constant 3 : index
    %c0_244 = arith.constant 0 : index
    %c0_245 = arith.constant 0 : index
    %322 = vector.load %arg7[%c3_243, %c0_244, %c0_245] : memref<9x16x36xf32, #tpu.memory_space<vmem>>, vector<1x16x36xf32>
    %323 = vector.shape_cast %322 : vector<1x16x36xf32> to vector<16x36xf32>
    %324 = vector.shape_cast %321 : vector<16x36xf32> to vector<1x16x36xf32>
    tpu.vector_store %arg7[%c3_243, %c0_244, %c0_245], %324 {strides = array<i32>} : memref<9x16x36xf32, #tpu.memory_space<vmem>>, vector<1x16x36xf32>,
    %c0_246 = arith.constant 0 : index
    %c0_247 = arith.constant 0 : index
    %c1_248 = arith.constant 1 : index
    %c0_249 = arith.constant 0 : index
    %325 = vector.load %arg2[%c0_246, %c0_247, %c1_248, %c0_249] : memref<1x3x18x38xf32, #tpu.memory_space<vmem>>, vector<1x1x16x36xf32>
    %326 = vector.shape_cast %325 : vector<1x1x16x36xf32> to vector<16x36xf32>
    %327 = arith.mulf %326, %321 : vector<16x36xf32>
    %328 = arith.addf %317, %327 : vector<16x36xf32>
    %c1_250 = arith.constant 1 : index
    %c1_251 = arith.constant 1 : index
    %329 = vector.load %arg8[%c1_250, %c1_251] : memref<18x38xf32, #tpu.memory_space<vmem>>, vector<16x36xf32>
    %c4_252 = arith.constant 4 : index
    %c0_253 = arith.constant 0 : index
    %c0_254 = arith.constant 0 : index
    %330 = vector.load %arg7[%c4_252, %c0_253, %c0_254] : memref<9x16x36xf32, #tpu.memory_space<vmem>>, vector<1x16x36xf32>
    %331 = vector.shape_cast %330 : vector<1x16x36xf32> to vector<16x36xf32>
    %332 = arith.mulf %329, %331 : vector<16x36xf32>
    %c4_255 = arith.constant 4 : index
    %c0_256 = arith.constant 0 : index
    %c0_257 = arith.constant 0 : index
    %333 = vector.load %arg7[%c4_255, %c0_256, %c0_257] : memref<9x16x36xf32, #tpu.memory_space<vmem>>, vector<1x16x36xf32>
    %334 = vector.shape_cast %333 : vector<1x16x36xf32> to vector<16x36xf32>
    %335 = vector.shape_cast %332 : vector<16x36xf32> to vector<1x16x36xf32>
    tpu.vector_store %arg7[%c4_255, %c0_256, %c0_257], %335 {strides = array<i32>} : memref<9x16x36xf32, #tpu.memory_space<vmem>>, vector<1x16x36xf32>,
    %c0_258 = arith.constant 0 : index
    %c0_259 = arith.constant 0 : index
    %c1_260 = arith.constant 1 : index
    %c1_261 = arith.constant 1 : index
    %336 = vector.load %arg2[%c0_258, %c0_259, %c1_260, %c1_261] : memref<1x3x18x38xf32, #tpu.memory_space<vmem>>, vector<1x1x16x36xf32>
    %337 = vector.shape_cast %336 : vector<1x1x16x36xf32> to vector<16x36xf32>
    %338 = arith.mulf %337, %332 : vector<16x36xf32>
    %339 = arith.addf %328, %338 : vector<16x36xf32>
    %c1_262 = arith.constant 1 : index
    %c2_263 = arith.constant 2 : index
    %340 = vector.load %arg8[%c1_262, %c2_263] : memref<18x38xf32, #tpu.memory_space<vmem>>, vector<16x36xf32>
    %c5_264 = arith.constant 5 : index
    %c0_265 = arith.constant 0 : index
    %c0_266 = arith.constant 0 : index
    %341 = vector.load %arg7[%c5_264, %c0_265, %c0_266] : memref<9x16x36xf32, #tpu.memory_space<vmem>>, vector<1x16x36xf32>
    %342 = vector.shape_cast %341 : vector<1x16x36xf32> to vector<16x36xf32>
    %343 = arith.mulf %340, %342 : vector<16x36xf32>
    %c5_267 = arith.constant 5 : index
    %c0_268 = arith.constant 0 : index
    %c0_269 = arith.constant 0 : index
    %344 = vector.load %arg7[%c5_267, %c0_268, %c0_269] : memref<9x16x36xf32, #tpu.memory_space<vmem>>, vector<1x16x36xf32>
    %345 = vector.shape_cast %344 : vector<1x16x36xf32> to vector<16x36xf32>
    %346 = vector.shape_cast %343 : vector<16x36xf32> to vector<1x16x36xf32>
    tpu.vector_store %arg7[%c5_267, %c0_268, %c0_269], %346 {strides = array<i32>} : memref<9x16x36xf32, #tpu.memory_space<vmem>>, vector<1x16x36xf32>,
    %c0_270 = arith.constant 0 : index
    %c0_271 = arith.constant 0 : index
    %c1_272 = arith.constant 1 : index
    %c2_273 = arith.constant 2 : index
    %347 = vector.load %arg2[%c0_270, %c0_271, %c1_272, %c2_273] : memref<1x3x18x38xf32, #tpu.memory_space<vmem>>, vector<1x1x16x36xf32>
    %348 = vector.shape_cast %347 : vector<1x1x16x36xf32> to vector<16x36xf32>
    %349 = arith.mulf %348, %343 : vector<16x36xf32>
    %350 = arith.addf %339, %349 : vector<16x36xf32>
    %c2_274 = arith.constant 2 : index
    %c0_275 = arith.constant 0 : index
    %351 = vector.load %arg8[%c2_274, %c0_275] : memref<18x38xf32, #tpu.memory_space<vmem>>, vector<16x36xf32>
    %c6_276 = arith.constant 6 : index
    %c0_277 = arith.constant 0 : index
    %c0_278 = arith.constant 0 : index
    %352 = vector.load %arg7[%c6_276, %c0_277, %c0_278] : memref<9x16x36xf32, #tpu.memory_space<vmem>>, vector<1x16x36xf32>
    %353 = vector.shape_cast %352 : vector<1x16x36xf32> to vector<16x36xf32>
    %354 = arith.mulf %351, %353 : vector<16x36xf32>
    %c6_279 = arith.constant 6 : index
    %c0_280 = arith.constant 0 : index
    %c0_281 = arith.constant 0 : index
    %355 = vector.load %arg7[%c6_279, %c0_280, %c0_281] : memref<9x16x36xf32, #tpu.memory_space<vmem>>, vector<1x16x36xf32>
    %356 = vector.shape_cast %355 : vector<1x16x36xf32> to vector<16x36xf32>
    %357 = vector.shape_cast %354 : vector<16x36xf32> to vector<1x16x36xf32>
    tpu.vector_store %arg7[%c6_279, %c0_280, %c0_281], %357 {strides = array<i32>} : memref<9x16x36xf32, #tpu.memory_space<vmem>>, vector<1x16x36xf32>,
    %c0_282 = arith.constant 0 : index
    %c0_283 = arith.constant 0 : index
    %c2_284 = arith.constant 2 : index
    %c0_285 = arith.constant 0 : index
    %358 = vector.load %arg2[%c0_282, %c0_283, %c2_284, %c0_285] : memref<1x3x18x38xf32, #tpu.memory_space<vmem>>, vector<1x1x16x36xf32>
    %359 = vector.shape_cast %358 : vector<1x1x16x36xf32> to vector<16x36xf32>
    %360 = arith.mulf %359, %354 : vector<16x36xf32>
    %361 = arith.addf %350, %360 : vector<16x36xf32>
    %c2_286 = arith.constant 2 : index
    %c1_287 = arith.constant 1 : index
    %362 = vector.load %arg8[%c2_286, %c1_287] : memref<18x38xf32, #tpu.memory_space<vmem>>, vector<16x36xf32>
    %c7_288 = arith.constant 7 : index
    %c0_289 = arith.constant 0 : index
    %c0_290 = arith.constant 0 : index
    %363 = vector.load %arg7[%c7_288, %c0_289, %c0_290] : memref<9x16x36xf32, #tpu.memory_space<vmem>>, vector<1x16x36xf32>
    %364 = vector.shape_cast %363 : vector<1x16x36xf32> to vector<16x36xf32>
    %365 = arith.mulf %362, %364 : vector<16x36xf32>
    %c7_291 = arith.constant 7 : index
    %c0_292 = arith.constant 0 : index
    %c0_293 = arith.constant 0 : index
    %366 = vector.load %arg7[%c7_291, %c0_292, %c0_293] : memref<9x16x36xf32, #tpu.memory_space<vmem>>, vector<1x16x36xf32>
    %367 = vector.shape_cast %366 : vector<1x16x36xf32> to vector<16x36xf32>
    %368 = vector.shape_cast %365 : vector<16x36xf32> to vector<1x16x36xf32>
    tpu.vector_store %arg7[%c7_291, %c0_292, %c0_293], %368 {strides = array<i32>} : memref<9x16x36xf32, #tpu.memory_space<vmem>>, vector<1x16x36xf32>,
    %c0_294 = arith.constant 0 : index
    %c0_295 = arith.constant 0 : index
    %c2_296 = arith.constant 2 : index
    %c1_297 = arith.constant 1 : index
    %369 = vector.load %arg2[%c0_294, %c0_295, %c2_296, %c1_297] : memref<1x3x18x38xf32, #tpu.memory_space<vmem>>, vector<1x1x16x36xf32>
    %370 = vector.shape_cast %369 : vector<1x1x16x36xf32> to vector<16x36xf32>
    %371 = arith.mulf %370, %365 : vector<16x36xf32>
    %372 = arith.addf %361, %371 : vector<16x36xf32>
    %c2_298 = arith.constant 2 : index
    %c2_299 = arith.constant 2 : index
    %373 = vector.load %arg8[%c2_298, %c2_299] : memref<18x38xf32, #tpu.memory_space<vmem>>, vector<16x36xf32>
    %c8_300 = arith.constant 8 : index
    %c0_301 = arith.constant 0 : index
    %c0_302 = arith.constant 0 : index
    %374 = vector.load %arg7[%c8_300, %c0_301, %c0_302] : memref<9x16x36xf32, #tpu.memory_space<vmem>>, vector<1x16x36xf32>
    %375 = vector.shape_cast %374 : vector<1x16x36xf32> to vector<16x36xf32>
    %376 = arith.mulf %373, %375 : vector<16x36xf32>
    %c8_303 = arith.constant 8 : index
    %c0_304 = arith.constant 0 : index
    %c0_305 = arith.constant 0 : index
    %377 = vector.load %arg7[%c8_303, %c0_304, %c0_305] : memref<9x16x36xf32, #tpu.memory_space<vmem>>, vector<1x16x36xf32>
    %378 = vector.shape_cast %377 : vector<1x16x36xf32> to vector<16x36xf32>
    %379 = vector.shape_cast %376 : vector<16x36xf32> to vector<1x16x36xf32>
    tpu.vector_store %arg7[%c8_303, %c0_304, %c0_305], %379 {strides = array<i32>} : memref<9x16x36xf32, #tpu.memory_space<vmem>>, vector<1x16x36xf32>,
    %c0_306 = arith.constant 0 : index
    %c0_307 = arith.constant 0 : index
    %c2_308 = arith.constant 2 : index
    %c2_309 = arith.constant 2 : index
    %380 = vector.load %arg2[%c0_306, %c0_307, %c2_308, %c2_309] : memref<1x3x18x38xf32, #tpu.memory_space<vmem>>, vector<1x1x16x36xf32>
    %381 = vector.shape_cast %380 : vector<1x1x16x36xf32> to vector<16x36xf32>
    %382 = arith.mulf %381, %376 : vector<16x36xf32>
    %383 = arith.addf %372, %382 : vector<16x36xf32>
    %c0_310 = arith.constant 0 : index
    %c0_311 = arith.constant 0 : index
    %c0_312 = arith.constant 0 : index
    %c0_313 = arith.constant 0 : index
    %384 = vector.load %arg4[%c0_310, %c0_311, %c0_312, %c0_313] : memref<1x3x16x36xf32, #tpu.memory_space<vmem>>, vector<1x1x16x36xf32>
    %385 = vector.shape_cast %384 : vector<1x1x16x36xf32> to vector<16x36xf32>
    %386 = vector.shape_cast %383 : vector<16x36xf32> to vector<1x1x16x36xf32>
    tpu.vector_store %arg4[%c0_310, %c0_311, %c0_312, %c0_313], %386 {strides = array<i32>} : memref<1x3x16x36xf32, #tpu.memory_space<vmem>>, vector<1x1x16x36xf32>,
    %c0_314 = arith.constant 0 : index
    %c1_315 = arith.constant 1 : index
    %c0_316 = arith.constant 0 : index
    %c0_317 = arith.constant 0 : index
    %387 = vector.load %arg2[%c0_314, %c1_315, %c0_316, %c0_317] : memref<1x3x18x38xf32, #tpu.memory_space<vmem>>, vector<1x1x16x36xf32>
    %388 = vector.shape_cast %387 : vector<1x1x16x36xf32> to vector<16x36xf32>
    %c0_318 = arith.constant 0 : index
    %c0_319 = arith.constant 0 : index
    %c0_320 = arith.constant 0 : index
    %389 = vector.load %arg7[%c0_318, %c0_319, %c0_320] : memref<9x16x36xf32, #tpu.memory_space<vmem>>, vector<1x16x36xf32>
    %390 = vector.shape_cast %389 : vector<1x16x36xf32> to vector<16x36xf32>
    %391 = arith.mulf %388, %390 : vector<16x36xf32>
    %c0_321 = arith.constant 0 : index
    %c1_322 = arith.constant 1 : index
    %c0_323 = arith.constant 0 : index
    %c1_324 = arith.constant 1 : index
    %392 = vector.load %arg2[%c0_321, %c1_322, %c0_323, %c1_324] : memref<1x3x18x38xf32, #tpu.memory_space<vmem>>, vector<1x1x16x36xf32>
    %393 = vector.shape_cast %392 : vector<1x1x16x36xf32> to vector<16x36xf32>
    %c1_325 = arith.constant 1 : index
    %c0_326 = arith.constant 0 : index
    %c0_327 = arith.constant 0 : index
    %394 = vector.load %arg7[%c1_325, %c0_326, %c0_327] : memref<9x16x36xf32, #tpu.memory_space<vmem>>, vector<1x16x36xf32>
    %395 = vector.shape_cast %394 : vector<1x16x36xf32> to vector<16x36xf32>
    %396 = arith.mulf %393, %395 : vector<16x36xf32>
    %397 = arith.addf %391, %396 : vector<16x36xf32>
    %c0_328 = arith.constant 0 : index
    %c1_329 = arith.constant 1 : index
    %c0_330 = arith.constant 0 : index
    %c2_331 = arith.constant 2 : index
    %398 = vector.load %arg2[%c0_328, %c1_329, %c0_330, %c2_331] : memref<1x3x18x38xf32, #tpu.memory_space<vmem>>, vector<1x1x16x36xf32>
    %399 = vector.shape_cast %398 : vector<1x1x16x36xf32> to vector<16x36xf32>
    %c2_332 = arith.constant 2 : index
    %c0_333 = arith.constant 0 : index
    %c0_334 = arith.constant 0 : index
    %400 = vector.load %arg7[%c2_332, %c0_333, %c0_334] : memref<9x16x36xf32, #tpu.memory_space<vmem>>, vector<1x16x36xf32>
    %401 = vector.shape_cast %400 : vector<1x16x36xf32> to vector<16x36xf32>
    %402 = arith.mulf %399, %401 : vector<16x36xf32>
    %403 = arith.addf %397, %402 : vector<16x36xf32>
    %c0_335 = arith.constant 0 : index
    %c1_336 = arith.constant 1 : index
    %c1_337 = arith.constant 1 : index
    %c0_338 = arith.constant 0 : index
    %404 = vector.load %arg2[%c0_335, %c1_336, %c1_337, %c0_338] : memref<1x3x18x38xf32, #tpu.memory_space<vmem>>, vector<1x1x16x36xf32>
    %405 = vector.shape_cast %404 : vector<1x1x16x36xf32> to vector<16x36xf32>
    %c3_339 = arith.constant 3 : index
    %c0_340 = arith.constant 0 : index
    %c0_341 = arith.constant 0 : index
    %406 = vector.load %arg7[%c3_339, %c0_340, %c0_341] : memref<9x16x36xf32, #tpu.memory_space<vmem>>, vector<1x16x36xf32>
    %407 = vector.shape_cast %406 : vector<1x16x36xf32> to vector<16x36xf32>
    %408 = arith.mulf %405, %407 : vector<16x36xf32>
    %409 = arith.addf %403, %408 : vector<16x36xf32>
    %c0_342 = arith.constant 0 : index
    %c1_343 = arith.constant 1 : index
    %c1_344 = arith.constant 1 : index
    %c1_345 = arith.constant 1 : index
    %410 = vector.load %arg2[%c0_342, %c1_343, %c1_344, %c1_345] : memref<1x3x18x38xf32, #tpu.memory_space<vmem>>, vector<1x1x16x36xf32>
    %411 = vector.shape_cast %410 : vector<1x1x16x36xf32> to vector<16x36xf32>
    %c4_346 = arith.constant 4 : index
    %c0_347 = arith.constant 0 : index
    %c0_348 = arith.constant 0 : index
    %412 = vector.load %arg7[%c4_346, %c0_347, %c0_348] : memref<9x16x36xf32, #tpu.memory_space<vmem>>, vector<1x16x36xf32>
    %413 = vector.shape_cast %412 : vector<1x16x36xf32> to vector<16x36xf32>
    %414 = arith.mulf %411, %413 : vector<16x36xf32>
    %415 = arith.addf %409, %414 : vector<16x36xf32>
    %c0_349 = arith.constant 0 : index
    %c1_350 = arith.constant 1 : index
    %c1_351 = arith.constant 1 : index
    %c2_352 = arith.constant 2 : index
    %416 = vector.load %arg2[%c0_349, %c1_350, %c1_351, %c2_352] : memref<1x3x18x38xf32, #tpu.memory_space<vmem>>, vector<1x1x16x36xf32>
    %417 = vector.shape_cast %416 : vector<1x1x16x36xf32> to vector<16x36xf32>
    %c5_353 = arith.constant 5 : index
    %c0_354 = arith.constant 0 : index
    %c0_355 = arith.constant 0 : index
    %418 = vector.load %arg7[%c5_353, %c0_354, %c0_355] : memref<9x16x36xf32, #tpu.memory_space<vmem>>, vector<1x16x36xf32>
    %419 = vector.shape_cast %418 : vector<1x16x36xf32> to vector<16x36xf32>
    %420 = arith.mulf %417, %419 : vector<16x36xf32>
    %421 = arith.addf %415, %420 : vector<16x36xf32>
    %c0_356 = arith.constant 0 : index
    %c1_357 = arith.constant 1 : index
    %c2_358 = arith.constant 2 : index
    %c0_359 = arith.constant 0 : index
    %422 = vector.load %arg2[%c0_356, %c1_357, %c2_358, %c0_359] : memref<1x3x18x38xf32, #tpu.memory_space<vmem>>, vector<1x1x16x36xf32>
    %423 = vector.shape_cast %422 : vector<1x1x16x36xf32> to vector<16x36xf32>
    %c6_360 = arith.constant 6 : index
    %c0_361 = arith.constant 0 : index
    %c0_362 = arith.constant 0 : index
    %424 = vector.load %arg7[%c6_360, %c0_361, %c0_362] : memref<9x16x36xf32, #tpu.memory_space<vmem>>, vector<1x16x36xf32>
    %425 = vector.shape_cast %424 : vector<1x16x36xf32> to vector<16x36xf32>
    %426 = arith.mulf %423, %425 : vector<16x36xf32>
    %427 = arith.addf %421, %426 : vector<16x36xf32>
    %c0_363 = arith.constant 0 : index
    %c1_364 = arith.constant 1 : index
    %c2_365 = arith.constant 2 : index
    %c1_366 = arith.constant 1 : index
    %428 = vector.load %arg2[%c0_363, %c1_364, %c2_365, %c1_366] : memref<1x3x18x38xf32, #tpu.memory_space<vmem>>, vector<1x1x16x36xf32>
    %429 = vector.shape_cast %428 : vector<1x1x16x36xf32> to vector<16x36xf32>
    %c7_367 = arith.constant 7 : index
    %c0_368 = arith.constant 0 : index
    %c0_369 = arith.constant 0 : index
    %430 = vector.load %arg7[%c7_367, %c0_368, %c0_369] : memref<9x16x36xf32, #tpu.memory_space<vmem>>, vector<1x16x36xf32>
    %431 = vector.shape_cast %430 : vector<1x16x36xf32> to vector<16x36xf32>
    %432 = arith.mulf %429, %431 : vector<16x36xf32>
    %433 = arith.addf %427, %432 : vector<16x36xf32>
    %c0_370 = arith.constant 0 : index
    %c1_371 = arith.constant 1 : index
    %c2_372 = arith.constant 2 : index
    %c2_373 = arith.constant 2 : index
    %434 = vector.load %arg2[%c0_370, %c1_371, %c2_372, %c2_373] : memref<1x3x18x38xf32, #tpu.memory_space<vmem>>, vector<1x1x16x36xf32>
    %435 = vector.shape_cast %434 : vector<1x1x16x36xf32> to vector<16x36xf32>
    %c8_374 = arith.constant 8 : index
    %c0_375 = arith.constant 0 : index
    %c0_376 = arith.constant 0 : index
    %436 = vector.load %arg7[%c8_374, %c0_375, %c0_376] : memref<9x16x36xf32, #tpu.memory_space<vmem>>, vector<1x16x36xf32>
    %437 = vector.shape_cast %436 : vector<1x16x36xf32> to vector<16x36xf32>
    %438 = arith.mulf %435, %437 : vector<16x36xf32>
    %439 = arith.addf %433, %438 : vector<16x36xf32>
    %c0_377 = arith.constant 0 : index
    %c1_378 = arith.constant 1 : index
    %c0_379 = arith.constant 0 : index
    %c0_380 = arith.constant 0 : index
    %440 = vector.load %arg4[%c0_377, %c1_378, %c0_379, %c0_380] : memref<1x3x16x36xf32, #tpu.memory_space<vmem>>, vector<1x1x16x36xf32>
    %441 = vector.shape_cast %440 : vector<1x1x16x36xf32> to vector<16x36xf32>
    %442 = vector.shape_cast %439 : vector<16x36xf32> to vector<1x1x16x36xf32>
    tpu.vector_store %arg4[%c0_377, %c1_378, %c0_379, %c0_380], %442 {strides = array<i32>} : memref<1x3x16x36xf32, #tpu.memory_space<vmem>>, vector<1x1x16x36xf32>,
    %c0_381 = arith.constant 0 : index
    %c2_382 = arith.constant 2 : index
    %c0_383 = arith.constant 0 : index
    %c0_384 = arith.constant 0 : index
    %443 = vector.load %arg2[%c0_381, %c2_382, %c0_383, %c0_384] : memref<1x3x18x38xf32, #tpu.memory_space<vmem>>, vector<1x1x16x36xf32>
    %444 = vector.shape_cast %443 : vector<1x1x16x36xf32> to vector<16x36xf32>
    %c0_385 = arith.constant 0 : index
    %c0_386 = arith.constant 0 : index
    %c0_387 = arith.constant 0 : index
    %445 = vector.load %arg7[%c0_385, %c0_386, %c0_387] : memref<9x16x36xf32, #tpu.memory_space<vmem>>, vector<1x16x36xf32>
    %446 = vector.shape_cast %445 : vector<1x16x36xf32> to vector<16x36xf32>
    %447 = arith.mulf %444, %446 : vector<16x36xf32>
    %c0_388 = arith.constant 0 : index
    %c2_389 = arith.constant 2 : index
    %c0_390 = arith.constant 0 : index
    %c1_391 = arith.constant 1 : index
    %448 = vector.load %arg2[%c0_388, %c2_389, %c0_390, %c1_391] : memref<1x3x18x38xf32, #tpu.memory_space<vmem>>, vector<1x1x16x36xf32>
    %449 = vector.shape_cast %448 : vector<1x1x16x36xf32> to vector<16x36xf32>
    %c1_392 = arith.constant 1 : index
    %c0_393 = arith.constant 0 : index
    %c0_394 = arith.constant 0 : index
    %450 = vector.load %arg7[%c1_392, %c0_393, %c0_394] : memref<9x16x36xf32, #tpu.memory_space<vmem>>, vector<1x16x36xf32>
    %451 = vector.shape_cast %450 : vector<1x16x36xf32> to vector<16x36xf32>
    %452 = arith.mulf %449, %451 : vector<16x36xf32>
    %453 = arith.addf %447, %452 : vector<16x36xf32>
    %c0_395 = arith.constant 0 : index
    %c2_396 = arith.constant 2 : index
    %c0_397 = arith.constant 0 : index
    %c2_398 = arith.constant 2 : index
    %454 = vector.load %arg2[%c0_395, %c2_396, %c0_397, %c2_398] : memref<1x3x18x38xf32, #tpu.memory_space<vmem>>, vector<1x1x16x36xf32>
    %455 = vector.shape_cast %454 : vector<1x1x16x36xf32> to vector<16x36xf32>
    %c2_399 = arith.constant 2 : index
    %c0_400 = arith.constant 0 : index
    %c0_401 = arith.constant 0 : index
    %456 = vector.load %arg7[%c2_399, %c0_400, %c0_401] : memref<9x16x36xf32, #tpu.memory_space<vmem>>, vector<1x16x36xf32>
    %457 = vector.shape_cast %456 : vector<1x16x36xf32> to vector<16x36xf32>
    %458 = arith.mulf %455, %457 : vector<16x36xf32>
    %459 = arith.addf %453, %458 : vector<16x36xf32>
    %c0_402 = arith.constant 0 : index
    %c2_403 = arith.constant 2 : index
    %c1_404 = arith.constant 1 : index
    %c0_405 = arith.constant 0 : index
    %460 = vector.load %arg2[%c0_402, %c2_403, %c1_404, %c0_405] : memref<1x3x18x38xf32, #tpu.memory_space<vmem>>, vector<1x1x16x36xf32>
    %461 = vector.shape_cast %460 : vector<1x1x16x36xf32> to vector<16x36xf32>
    %c3_406 = arith.constant 3 : index
    %c0_407 = arith.constant 0 : index
    %c0_408 = arith.constant 0 : index
    %462 = vector.load %arg7[%c3_406, %c0_407, %c0_408] : memref<9x16x36xf32, #tpu.memory_space<vmem>>, vector<1x16x36xf32>
    %463 = vector.shape_cast %462 : vector<1x16x36xf32> to vector<16x36xf32>
    %464 = arith.mulf %461, %463 : vector<16x36xf32>
    %465 = arith.addf %459, %464 : vector<16x36xf32>
    %c0_409 = arith.constant 0 : index
    %c2_410 = arith.constant 2 : index
    %c1_411 = arith.constant 1 : index
    %c1_412 = arith.constant 1 : index
    %466 = vector.load %arg2[%c0_409, %c2_410, %c1_411, %c1_412] : memref<1x3x18x38xf32, #tpu.memory_space<vmem>>, vector<1x1x16x36xf32>
    %467 = vector.shape_cast %466 : vector<1x1x16x36xf32> to vector<16x36xf32>
    %c4_413 = arith.constant 4 : index
    %c0_414 = arith.constant 0 : index
    %c0_415 = arith.constant 0 : index
    %468 = vector.load %arg7[%c4_413, %c0_414, %c0_415] : memref<9x16x36xf32, #tpu.memory_space<vmem>>, vector<1x16x36xf32>
    %469 = vector.shape_cast %468 : vector<1x16x36xf32> to vector<16x36xf32>
    %470 = arith.mulf %467, %469 : vector<16x36xf32>
    %471 = arith.addf %465, %470 : vector<16x36xf32>
    %c0_416 = arith.constant 0 : index
    %c2_417 = arith.constant 2 : index
    %c1_418 = arith.constant 1 : index
    %c2_419 = arith.constant 2 : index
    %472 = vector.load %arg2[%c0_416, %c2_417, %c1_418, %c2_419] : memref<1x3x18x38xf32, #tpu.memory_space<vmem>>, vector<1x1x16x36xf32>
    %473 = vector.shape_cast %472 : vector<1x1x16x36xf32> to vector<16x36xf32>
    %c5_420 = arith.constant 5 : index
    %c0_421 = arith.constant 0 : index
    %c0_422 = arith.constant 0 : index
    %474 = vector.load %arg7[%c5_420, %c0_421, %c0_422] : memref<9x16x36xf32, #tpu.memory_space<vmem>>, vector<1x16x36xf32>
    %475 = vector.shape_cast %474 : vector<1x16x36xf32> to vector<16x36xf32>
    %476 = arith.mulf %473, %475 : vector<16x36xf32>
    %477 = arith.addf %471, %476 : vector<16x36xf32>
    %c0_423 = arith.constant 0 : index
    %c2_424 = arith.constant 2 : index
    %c2_425 = arith.constant 2 : index
    %c0_426 = arith.constant 0 : index
    %478 = vector.load %arg2[%c0_423, %c2_424, %c2_425, %c0_426] : memref<1x3x18x38xf32, #tpu.memory_space<vmem>>, vector<1x1x16x36xf32>
    %479 = vector.shape_cast %478 : vector<1x1x16x36xf32> to vector<16x36xf32>
    %c6_427 = arith.constant 6 : index
    %c0_428 = arith.constant 0 : index
    %c0_429 = arith.constant 0 : index
    %480 = vector.load %arg7[%c6_427, %c0_428, %c0_429] : memref<9x16x36xf32, #tpu.memory_space<vmem>>, vector<1x16x36xf32>
    %481 = vector.shape_cast %480 : vector<1x16x36xf32> to vector<16x36xf32>
    %482 = arith.mulf %479, %481 : vector<16x36xf32>
    %483 = arith.addf %477, %482 : vector<16x36xf32>
    %c0_430 = arith.constant 0 : index
    %c2_431 = arith.constant 2 : index
    %c2_432 = arith.constant 2 : index
    %c1_433 = arith.constant 1 : index
    %484 = vector.load %arg2[%c0_430, %c2_431, %c2_432, %c1_433] : memref<1x3x18x38xf32, #tpu.memory_space<vmem>>, vector<1x1x16x36xf32>
    %485 = vector.shape_cast %484 : vector<1x1x16x36xf32> to vector<16x36xf32>
    %c7_434 = arith.constant 7 : index
    %c0_435 = arith.constant 0 : index
    %c0_436 = arith.constant 0 : index
    %486 = vector.load %arg7[%c7_434, %c0_435, %c0_436] : memref<9x16x36xf32, #tpu.memory_space<vmem>>, vector<1x16x36xf32>
    %487 = vector.shape_cast %486 : vector<1x16x36xf32> to vector<16x36xf32>
    %488 = arith.mulf %485, %487 : vector<16x36xf32>
    %489 = arith.addf %483, %488 : vector<16x36xf32>
    %c0_437 = arith.constant 0 : index
    %c2_438 = arith.constant 2 : index
    %c2_439 = arith.constant 2 : index
    %c2_440 = arith.constant 2 : index
    %490 = vector.load %arg2[%c0_437, %c2_438, %c2_439, %c2_440] : memref<1x3x18x38xf32, #tpu.memory_space<vmem>>, vector<1x1x16x36xf32>
    %491 = vector.shape_cast %490 : vector<1x1x16x36xf32> to vector<16x36xf32>
    %c8_441 = arith.constant 8 : index
    %c0_442 = arith.constant 0 : index
    %c0_443 = arith.constant 0 : index
    %492 = vector.load %arg7[%c8_441, %c0_442, %c0_443] : memref<9x16x36xf32, #tpu.memory_space<vmem>>, vector<1x16x36xf32>
    %493 = vector.shape_cast %492 : vector<1x16x36xf32> to vector<16x36xf32>
    %494 = arith.mulf %491, %493 : vector<16x36xf32>
    %495 = arith.addf %489, %494 : vector<16x36xf32>
    %c0_444 = arith.constant 0 : index
    %c2_445 = arith.constant 2 : index
    %c0_446 = arith.constant 0 : index
    %c0_447 = arith.constant 0 : index
    %496 = vector.load %arg4[%c0_444, %c2_445, %c0_446, %c0_447] : memref<1x3x16x36xf32, #tpu.memory_space<vmem>>, vector<1x1x16x36xf32>
    %497 = vector.shape_cast %496 : vector<1x1x16x36xf32> to vector<16x36xf32>
    %498 = vector.shape_cast %495 : vector<16x36xf32> to vector<1x1x16x36xf32>
    tpu.vector_store %arg4[%c0_444, %c2_445, %c0_446, %c0_447], %498 {strides = array<i32>} : memref<1x3x16x36xf32, #tpu.memory_space<vmem>>, vector<1x1x16x36xf32>,
    return
  }
  func.func @transform_0(%arg0: i32) -> (i32, i32, i32) {
    %c0_i32 = arith.constant 0 : i32
    %c0_i32_0 = arith.constant 0 : i32
    %c0_i32_1 = arith.constant 0 : i32
    return %arg0, %c0_i32, %c0_i32_0 : i32, i32, i32
  }
  func.func @transform_1(%arg0: i32) -> (i32, i32, i32, i32) {
    %c0_i32 = arith.constant 0 : i32
    %c0_i32_0 = arith.constant 0 : i32
    %c0_i32_1 = arith.constant 0 : i32
    %c0_i32_2 = arith.constant 0 : i32
    return %arg0, %c0_i32, %c0_i32_0, %c0_i32_1 : i32, i32, i32, i32
  }
  func.func @transform_2(%arg0: i32) -> i32 {
    %c0_i32 = arith.constant 0 : i32
    %c0_i32_0 = arith.constant 0 : i32
    return %c0_i32 : i32
  }
  func.func @transform_3(%arg0: i32) -> (i32, i32, i32, i32) {
    %c0_i32 = arith.constant 0 : i32
    %c0_i32_0 = arith.constant 0 : i32
    %c0_i32_1 = arith.constant 0 : i32
    %c0_i32_2 = arith.constant 0 : i32
    return %arg0, %c0_i32, %c0_i32_0, %c0_i32_1 : i32, i32, i32, i32
  }
  func.func @transform_4(%arg0: i32) -> (i32, i32, i32, i32) {
    %c0_i32 = arith.constant 0 : i32
    %c0_i32_0 = arith.constant 0 : i32
    %c0_i32_1 = arith.constant 0 : i32
    %c0_i32_2 = arith.constant 0 : i32
    return %arg0, %c0_i32, %c0_i32_0, %c0_i32_1 : i32, i32, i32, i32
  }
  func.func @transform_5(%arg0: i32) -> (i32, i32, i32, i32) {
    %c0_i32 = arith.constant 0 : i32
    %c0_i32_0 = arith.constant 0 : i32
    %c0_i32_1 = arith.constant 0 : i32
    %c0_i32_2 = arith.constant 0 : i32
    return %arg0, %c0_i32, %c0_i32_0, %c0_i32_1 : i32, i32, i32, i32
  }
}

</mosaic_0001>

<bundles_post_ra>
// kernel: tpu_custom_call.1
= control target key start
LH: loop header
LB: loop body
LE: loop exit
PB: predicated region body
PF: predicated region fallthrough
CT: control target
= control target key end

     0   :  { %11 = vsyncpa [#allocation6], 0  ;;  %s2048_s0 = inlined_call_operand.vmem [shape: s32[1,18,38], index: 0, kind: input, shape index: {}]   ;;  %s2049_s1 = inlined_call_operand.vmem [shape: f32[1,3,18,38], index: 1, kind: input, shape index: {}]   ;;  %s2050_s2 = inlined_call_operand.vmem [shape: f32[36], index: 2, kind: input, shape index: {}]   ;;  %s2051_s3 = inlined_call_operand.hbm [shape: f32[1,3,16,36], index: 3, kind: output, shape index: {0}]   ;;  %s2052_s4 = inlined_call_operand.vmem [shape: f32[1,4,18,38], index: 4, kind: output, shape index: {1}]   ;;  %s2053_s5 = inlined_call_operand.hbm [shape: f32[1,1,16,36], index: 5, kind: output, shape index: {2}]  }
   0x1   :  { %12 = vsyncpa [#allocation5], 0 }
   0x2   :  { %13 = vsyncpa [#allocation9], 0  ;;  %s24_s20 = sshll.u32 %s2050_s2, 4  ;;  %s25_s20 = int_to_ptr.vmem [resolvable:$true] %s24_s20 }
   0x3   :  { %s1230_s21 = scalar_lea.vmem %s25_s20, 16  ;;  %p1235_p1 = scmp.lt.s32.totalorder %s25_s20, %s25_s20 }
   0x4   :  { %p1231_p0 = scmp.ne.s32.totalorder %s25_s20, %s1230_s21  ;;  %p1236_p2 = scmp.lt.s32.totalorder %s1230_s21, %s1230_s21 }
   0x6   :  { %p1237_p3 = por %p1236_p2, %p1235_p1 }
   0x8   :  { %p1238_p4 = pnand %p1237_p3, %p1231_p0 }
   0xa   :  { %1241 = shalt.err (!%p1238_p4)
}
   0xb   :  { %s1292_s22 = smov [#allocation4]  }
   0xc   :  { %27 = dma.vmem_to_smem %s25_s20, 16, %s1292_s22, [#allocation6]  }
   0xd   :  { %1286 = dma.done.wait [#allocation6], 16  }
   0xe   :  { %1287 = vsyncadd [#allocation6], 4294967280 }
   0xf   :  { %31 = sfence }
  0x10   :  { %s1335_s23 = sld [smem:[#allocation4 + $0x2]]  ;;  %s1337_s24 = sld [smem:[#allocation4 + $0xb]]  ;;  %v68_v0 = vld [vmem:[%s2048_s0] sm:$0xff]  ;;  %v69_v1 = vld [vmem:[%s2048_s0 + $0x8] sm:$0xff]  ;;  %vm80_vm2 = vcmask 310272   ;;  %v1293_v2 = vmov 0.0  }
  0x11   :  { %s1345_s28 = sld [smem:[#allocation4 + $0x14]]  ;;  %vm71_vm0 = vcmp.eq.s32.totalorder %v68_v0, 0  ;;  %vm72_vm1 = vcmp.eq.s32.totalorder %v69_v1, 0  ;;  %s1347_s29 = sld [smem:[#allocation4 + $0x1d]]  ;;  %vm85_vm3 = vcmp.eq.s32.totalorder %v68_v0, 1  ;;  %vm86_vm4 = vcmp.eq.s32.totalorder %v69_v1, 1 }
  0x12   :  { %v1131_v3 = vsel %vm71_vm0, 1.0, %v1293_v2  ;;  %v1132_v4 = vsel %vm72_vm1, 1.0, %v1293_v2  ;;  %v1134_v5 = vsel %vm85_vm3, 1.0, %v1293_v2  ;;  %v1135_v6 = vsel %vm86_vm4, 1.0, %v1293_v2  ;;  %459 = vst.msk [vmem:[#allocation3] sm:$0xff] %vm80_vm2, %v1293_v2  ;;  %460 = vst.msk [vmem:[#allocation3 + $0x8] sm:$0xff] %vm80_vm2, %v1293_v2 }
  0x13   :  { %s1351_s30 = sld [smem:[#allocation4 + $0x1]]  ;;  %81 = vst.msk [vmem:[%s2052_s4] sm:$0xff] %vm80_vm2, %v1131_v3  ;;  %82 = vst.msk [vmem:[%s2052_s4 + $0x8] sm:$0xff] %vm80_vm2, %v1132_v4  ;;  %vm98_vm5 = vcmp.eq.s32.totalorder %v68_v0, 2  ;;  %vm99_vm6 = vcmp.eq.s32.totalorder %v69_v1, 2  ;;  %vm111_vm7 = vcmp.eq.s32.totalorder %v68_v0, 3 }
  0x14   :  { %1137 = vst.msk [vmem:[%s2052_s4 + $0x18] sm:$0xff] %vm80_vm2, %v1134_v5  ;;  %1138 = vst.msk [vmem:[%s2052_s4 + $0x20] sm:$0xff] %vm80_vm2, %v1135_v6  ;;  %vm112_vm8 = vcmp.eq.s32.totalorder %v69_v1, 3  ;;  %s1369_s14 = sld [smem:[#allocation4 + $0xa]]  ;;  %v1140_v7 = vsel %vm98_vm5, 1.0, %v1293_v2  ;;  %v1141_v8 = vsel %vm99_vm6, 1.0, %v1293_v2 }
  0x15   :  { %v1146_v9 = vsel %vm111_vm7, 1.0, %v1293_v2  ;;  %v1147_v10 = vsel %vm112_vm8, 1.0, %v1293_v2  ;;  %s1371_s15 = sld [smem:[#allocation4 + $0x13]]  ;;  %1143 = vst.msk [vmem:[%s2052_s4 + $0x30] sm:$0xff] %vm80_vm2, %v1140_v7  ;;  %1144 = vst.msk [vmem:[%s2052_s4 + $0x38] sm:$0xff] %vm80_vm2, %v1141_v8  ;;  %vm83_vm10 = vcmask 304128  }
  0x16   :  { %1149 = vst.msk [vmem:[%s2052_s4 + $0x48] sm:$0xff] %vm80_vm2, %v1146_v9  ;;  %1150 = vst.msk [vmem:[%s2052_s4 + $0x50] sm:$0xff] %vm80_vm2, %v1147_v10  ;;  %v70_v11 = vld [vmem:[%s2048_s0 + $0x10] sm:$0x3]  ;;  %v194_v12 = vstv %s1335_s23  ;;  %s1394_s27 = sld [smem:[#allocation4 + $0x1c]]  ;;  %s1409_s7 = sld [smem:[#allocation4 + $0x16]] }
  0x17   :  { %v199_v13 = vstv %s1337_s24  ;;  %vm73_vm9 = vcmp.eq.s32.totalorder %v70_v11, 0  ;;  %vm87_vm11 = vcmp.eq.s32.totalorder %v70_v11, 1  ;;  %vm100_vm12 = vcmp.eq.s32.totalorder %v70_v11, 2  ;;  %461 = vst.msk [vmem:[#allocation3 + $0x10] sm:$0x3] %vm83_vm10, %v1293_v2  ;;  %s1398_s6 = sld [smem:[#allocation4 + $0x4]] }
  0x18   :  { %v1133_v14 = vsel %vm73_vm9, 1.0, %v1293_v2  ;;  %vm113_vm13 = vcmp.eq.s32.totalorder %v70_v11, 3  ;;  %v1136_v16 = vsel %vm87_vm11, 1.0, %v1293_v2  ;;  %v1142_v17 = vsel %vm100_vm12, 1.0, %v1293_v2  ;;  %s1407_s24 = sld [smem:[#allocation4 + $0xd]]  ;;  %s1439_s18 = sld [smem:[#allocation4 + $0x1f]] }
  0x19   :  { %v155_v15 = vstv %s1351_s30  ;;  %84 = vst.msk [vmem:[%s2052_s4 + $0x10] sm:$0x3] %vm83_vm10, %v1133_v14  ;;  %v1148_v18 = vsel %vm113_vm13, 1.0, %v1293_v2  ;;  %v206_v19 = vstv %s1345_s28  ;;  %v213_v20 = vstv %s1347_s29  ;;  %s1477_s30 = sld [smem:[#allocation4 + $0x5]]  ;;  %s1479_s8 = sld [smem:[#allocation4 + $0xe]] }
  0x1a   :  { %v160_v21 = vstv %s1369_s14  ;;  %1139 = vst.msk [vmem:[%s2052_s4 + $0x28] sm:$0x3] %vm83_vm10, %v1136_v16  ;;  %1145 = vst.msk [vmem:[%s2052_s4 + $0x40] sm:$0x3] %vm83_vm10, %v1142_v17  ;;  %v1426_v22 = vld [vmem:[%s2052_s4] sm:$0xff]  ;;  %s1484_s9 = sld [smem:[#allocation4 + $0x17]] }
  0x1b   :  { %1151 = vst.msk [vmem:[%s2052_s4 + $0x58] sm:$0x3] %vm83_vm10, %v1148_v18  ;;  %v1431_v23 = vld [vmem:[%s2052_s4 + $0x8] sm:$0xff]  ;;  %v1436_v24 = vld [vmem:[%s2052_s4 + $0x18] sm:$0xff]  ;;  %v167_v25 = vstv %s1371_s15  ;;  %v195_v26 = vmul.f32 %v194_v12, %v1426_v22  ;;  %v156_v30 = vmul.f32 %v1426_v22, %v155_v15  ;;  %s1492_s12 = sld [smem:[#allocation4 + $0x20]]  ;;  %s1528_s15 = sld [smem:[#allocation4 + $0x7]] }
  0x1c   :  { %v196_v27 = vmul.f32 %v194_v12, %v1431_v23  ;;  %v1446_v28 = vld [vmem:[%s2052_s4 + $0x20] sm:$0xff]  ;;  %v200_v29 = vmul.f32 %v1436_v24, %v199_v13  ;;  %v1454_v32 = vld [vmem:[%s2052_s4 + $0x30] sm:$0xff]  ;;  %v1459_v33 = vld [vmem:[%s2052_s4 + $0x38] sm:$0xff]  ;;  %v157_v35 = vmul.f32 %v1431_v23, %v155_v15  ;;  %v161_v36 = vmul.f32 %v1436_v24, %v160_v21  ;;  %s1538_s2 = sld [smem:[#allocation4 + $0x10]]  ;;  %s1294_s0 = smov 126  }
  0x1d   :  { %v201_v31 = vmul.f32 %v1446_v28, %v199_v13  ;;  %v1464_v34 = vld [vmem:[%s2052_s4 + $0x48] sm:$0xff]  ;;  %v162_v37 = vmul.f32 %v1446_v28, %v160_v21  ;;  %v207_v39 = vmul.f32 %v1454_v32, %v206_v19  ;;  %v208_v40 = vmul.f32 %v1459_v33, %v206_v19  ;;  %v1474_v41 = vld [vmem:[%s2052_s4 + $0x50] sm:$0xff]  ;;  %v1521_v0 = vld [vmem:[%s2052_s4 + $0x19] sm:$0xff]  ;;  %s1558_s23 = sld [smem:[#allocation4 + $0x8]]  ;;  %s1560_s10 = sld [smem:[#allocation4 + $0x11]] }
  0x1e   :  { %v202_v38 = vadd.f32 %v200_v29, %v195_v26  ;;  %v214_v42 = vmul.f32 %v1464_v34, %v213_v20  ;;  %v215_v43 = vmul.f32 %v1474_v41, %v213_v20  ;;  %v163_v44 = vadd.f32 %v161_v36, %v156_v30  ;;  %v1510_v58 = vld [vmem:[%s2052_s4 + $0x1] sm:$0xff]  ;;  %v1526_v1 = vld [vmem:[%s2052_s4 + $0x31] sm:$0xff]  ;;  %v1536_v6 = vld [vmem:[%s2052_s4 + $0x49] sm:$0xff]  ;;  %s1571_s11 = sld [smem:[#allocation4 + $0x1a]]  ;;  %s1617_s25 = sld [smem:[#allocation4 + $0x9]] }
  0x1f   :  { %v168_v45 = vmul.f32 %v1454_v32, %v167_v25  ;;  %v169_v46 = vmul.f32 %v1459_v33, %v167_v25  ;;  %v174_v48 = vstv %s1394_s27  ;;  %v203_v49 = vadd.f32 %v201_v31, %v196_v27  ;;  %s1624_s26 = sld [smem:[#allocation4 + $0x12]]  ;;  %s1296_s28 = smov 1  }
  0x20   :  { %v209_v47 = vadd.f32 %v207_v39, %v202_v38  ;;  %v164_v50 = vadd.f32 %v162_v37, %v157_v35  ;;  %v1490_v51 = vld [vmem:[%s2052_s4 + $0x9] sm:$0xff]  ;;  %v175_v53 = vmul.f32 %v1464_v34, %v174_v48  ;;  %v176_v54 = vmul.f32 %v1474_v41, %v174_v48  ;;  %s1298_s22 = smov [#allocation8]  }
  0x21   :  { %v170_v52 = vadd.f32 %v168_v45, %v163_v44  ;;  %v264_v55 = vstv %s1398_s6  ;;  %v1500_v56 = vld [vmem:[%s2052_s4 + $0x21] sm:$0xff]  ;;  %v1505_v57 = vld [vmem:[%s2052_s4 + $0x39] sm:$0xff]  ;;  %v210_v60 = vadd.f32 %v208_v40, %v203_v49  ;;  %v269_v3 = vstv %s1407_s24  ;;  %s1543_s24 = sld [smem:[#allocation4 + $0x19]] }
  0x22   :  { %v216_v59 = vadd.f32 %v214_v42, %v209_v47  ;;  %v171_v61 = vadd.f32 %v169_v46, %v164_v50  ;;  %v266_v62 = vmul.f32 %v264_v55, %v1490_v51  ;;  %v1516_v63 = vld [vmem:[%s2052_s4 + $0x51] sm:$0xff]  ;;  %v276_v4 = vstv %s1409_s7  ;;  %s1545_s7 = sld [smem:[#allocation4 + $0x22]]  ;;  %v1579_v39 = vld [vmem:[%s2052_s4 + $0x2] sm:$0xff]  ;;  %v1594_v46 = vld [vmem:[%s2052_s4 + $0x3a] sm:$0xff] }
  0x23   :  { %v177_v2 = vadd.f32 %v175_v53, %v170_v52  ;;  %v283_v5 = vstv %s1439_s18  ;;  %v217_v7 = vadd.f32 %v215_v43, %v210_v60  ;;  %v271_v9 = vmul.f32 %v1500_v56, %v269_v3  ;;  %s1295_s18 = smov 127   ;;  %v1569_v31 = vld [vmem:[%s2052_s4 + $0xa] sm:$0xff]  ;;  %v1589_v45 = vld [vmem:[%s2052_s4 + $0x22] sm:$0xff]  ;;  %v1599_v47 = vld [vmem:[%s2052_s4 + $0x1a] sm:$0xff] }
  0x24   :  { %220 = vrot.lane.b32.xlu1 %v216_v59, %s1294_s0  ;;  %v178_v8 = vadd.f32 %v176_v54, %v171_v61  ;;  %v278_v10 = vmul.f32 %v1505_v57, %v276_v4  ;;  %v285_v11 = vmul.f32 %v1516_v63, %v283_v5  ;;  %v265_v12 = vmul.f32 %v264_v55, %v1510_v58  ;;  %v1605_v53 = vld [vmem:[%s2052_s4 + $0x52] sm:$0xff]  ;;  %v1615_v55 = vld [vmem:[%s2052_s4 + $0x4a] sm:$0xff] }
  0x25   :  { %181 = vrot.lane.b32.xlu0 %v177_v2, %s1295_s18  ;;  %v270_v13 = vmul.f32 %v1521_v0, %v269_v3  ;;  %v277_v14 = vmul.f32 %v1526_v1, %v276_v4  ;;  %v273_v15 = vadd.f32 %v271_v9, %v266_v62  ;;  %v284_v16 = vmul.f32 %v1536_v6, %v283_v5  ;;  %v1610_v54 = vld [vmem:[%s2052_s4 + $0x32] sm:$0xff]  ;;  %s1629_s4 = sld [smem:[#allocation4 + $0x1b]] }
  0x26   :  { %v303_v17 = vstv %s1477_s30  ;;  %v308_v18 = vstv %s1479_s8  ;;  %v315_v25 = vstv %s1484_s9  ;;  %v322_v29 = vstv %s1492_s12  ;;  %s1581_s12 = sld [smem:[#allocation4 + $0x23]]  ;;  %s1647_s30 = sld [smem:[#allocation4 + $0x15]] }
  0x27   :  { %v272_v19 = vadd.f32 %v270_v13, %v265_v12  ;;  %v305_v20 = vmul.f32 %v303_v17, %v1490_v51  ;;  %v310_v21 = vmul.f32 %v1500_v56, %v308_v18  ;;  %v280_v26 = vadd.f32 %v278_v10, %v273_v15  ;;  %s1668_s8 = sld [smem:[#allocation4 + $0xf]]  ;;  %s1675_s9 = sld [smem:[#allocation4 + $0x21]] }
  0x28   :  { %222 = vrot.lane.b32.xlu1 %v217_v7, %s1294_s0  ;;  %v317_v27 = vmul.f32 %v1505_v57, %v315_v25  ;;  %v304_v30 = vmul.f32 %v303_v17, %v1510_v58  ;;  %v324_v37 = vmul.f32 %v1516_v63, %v322_v29  ;;  %v309_v38 = vmul.f32 %v1521_v0, %v308_v18 }
  0x29   :  { %183 = vrot.lane.b32.xlu0 %v178_v8, %s1295_s18  ;;  %v279_v35 = vadd.f32 %v277_v14, %v272_v19  ;;  %v312_v36 = vadd.f32 %v310_v21, %v305_v20  ;;  %v287_v40 = vadd.f32 %v285_v11, %v280_v26  ;;  %v316_v42 = vmul.f32 %v1526_v1, %v315_v25 }
  0x2a   :  { %v323_v43 = vmul.f32 %v1536_v6, %v322_v29  ;;  %v373_v44 = vstv %s1528_s15  ;;  %v311_v50 = vadd.f32 %v309_v38, %v304_v30  ;;  %v378_v59 = vstv %s1538_s2  ;;  %s1631_s2 = sld [smem:[#allocation4]]  ;;  %s1078_s15 = sshll.u32 %s1298_s22, 4  ;;  %s1079_s15 = int_to_ptr.vmem [resolvable:$true] %s1078_s15 }
  0x2b   :  { %v286_v48 = vadd.f32 %v284_v16, %v279_v35  ;;  %v319_v49 = vadd.f32 %v317_v27, %v312_v36  ;;  %v375_v52 = vmul.f32 %v373_v44, %v1569_v31  ;;  %v385_v60 = vstv %s1543_s24  ;;  %s1639_s24 = sld [smem:[#allocation4 + $0x3]]  ;;  %p1247_p6 = scmp.lt.s32.totalorder %s1079_s15, %s1079_s15 }
  0x2c   :  { %292 = vrot.lane.b32.xlu1 %v287_v40, %s1295_s18  ;;  %v392_v61 = vstv %s1545_s7  ;;  %v374_v62 = vmul.f32 %v373_v44, %v1579_v39  ;;  %v318_v3 = vadd.f32 %v316_v42, %v311_v50  ;;  %v380_v4 = vmul.f32 %v1589_v45, %v378_v59  ;;  %s1645_s7 = sld [smem:[#allocation4 + $0xc]] }
  0x2d   :  { %290 = vrot.lane.b32.xlu0 %v286_v48, %s1295_s18  ;;  %v326_v2 = vadd.f32 %v324_v37, %v319_v49  ;;  %v387_v5 = vmul.f32 %v1594_v46, %v385_v60  ;;  %v394_v7 = vmul.f32 %v1605_v53, %v392_v61  ;;  %v379_v8 = vmul.f32 %v1599_v47, %v378_v59 }
  0x2e   :  { %v386_v9 = vmul.f32 %v1610_v54, %v385_v60  ;;  %v393_v10 = vmul.f32 %v1615_v55, %v392_v61  ;;  %v325_v11 = vadd.f32 %v323_v43, %v318_v3  ;;  %v382_v12 = vadd.f32 %v380_v4, %v375_v52 }
  0x2f   :  { %v412_v13 = vstv %s1558_s23  ;;  %v417_v14 = vstv %s1560_s10  ;;  %v381_v15 = vadd.f32 %v379_v8, %v374_v62  ;;  %v424_v18 = vstv %s1571_s11  ;;  %s1655_s23 = sld [smem:[#allocation4 + $0x1e]]  ;;  %s1673_s11 = sld [smem:[#allocation4 + $0x18]] }
  0x30   :  { %331 = vrot.lane.b32.xlu1 %v326_v2, %s1294_s0  ;;  %v414_v16 = vmul.f32 %v412_v13, %v1569_v31  ;;  %v419_v17 = vmul.f32 %v1589_v45, %v417_v14  ;;  %v389_v19 = vadd.f32 %v387_v5, %v382_v12  ;;  %v426_v20 = vmul.f32 %v1594_v46, %v424_v18  ;;  %s1661_s10 = sld [smem:[#allocation4 + $0x6]] }
  0x31   :  { %329 = vrot.lane.b32.xlu0 %v325_v11, %s1294_s0  ;;  %v431_v21 = vstv %s1581_s12  ;;  %v413_v25 = vmul.f32 %v412_v13, %v1579_v39  ;;  %v388_v26 = vadd.f32 %v386_v9, %v381_v15  ;;  %v418_v30 = vmul.f32 %v1599_v47, %v417_v14  ;;  %s1297_s12 = smov 2  }
  0x32   :  { %v421_v27 = vadd.f32 %v419_v17, %v414_v16  ;;  %v433_v29 = vmul.f32 %v1605_v53, %v431_v21  ;;  %v396_v35 = vadd.f32 %v394_v7, %v389_v19  ;;  %v425_v36 = vmul.f32 %v1610_v54, %v424_v18 }
  0x33   :  { %v432_v37 = vmul.f32 %v1615_v55, %v431_v21  ;;  %v131_v38 = vstv %s1617_s25  ;;  %v395_v40 = vadd.f32 %v393_v10, %v388_v26  ;;  %v420_v43 = vadd.f32 %v418_v30, %v413_v25  ;;  %s1242_s25 = scalar_lea.vmem %s1079_s15, 256 }
  0x34   :  { %v428_v42 = vadd.f32 %v426_v20, %v421_v27  ;;  %v132_v44 = vmul.f32 %v1436_v24, %v131_v38  ;;  %401 = vrot.lane.b32.xlu1 %v396_v35, %s1295_s18  ;;  %v138_v48 = vstv %s1624_s26  ;;  %v145_v49 = vstv %s1629_s4  ;;  %p1243_p5 = scmp.ne.s32.totalorder %s1079_s15, %s1242_s25  ;;  %p1248_p7 = scmp.lt.s32.totalorder %s1242_s25, %s1242_s25 }
  0x35   :  { %v126_v50 = vstv %s1631_s2  ;;  %v133_v52 = vmul.f32 %v1446_v28, %v131_v38  ;;  %399 = vrot.lane.b32.xlu0 %v395_v40, %s1295_s18  ;;  %v427_v60 = vadd.f32 %v425_v36, %v420_v43  ;;  %vm150_vm14 = vcmask 293888  }
  0x36   :  { %v435_v59 = vadd.f32 %v433_v29, %v428_v42  ;;  %v139_v24 = vmul.f32 %v1454_v32, %v138_v48  ;;  %v146_v61 = vmul.f32 %v1464_v34, %v145_v49  ;;  %v127_v28 = vmul.f32 %v1426_v22, %v126_v50  ;;  %p1249_p8 = por %p1248_p7, %p1247_p6 }
  0x37   :  { %v140_v62 = vmul.f32 %v1459_v33, %v138_v48  ;;  %v147_v2 = vmul.f32 %v1474_v41, %v145_v49  ;;  %v128_v3 = vmul.f32 %v1431_v23, %v126_v50  ;;  %v434_v4 = vadd.f32 %v432_v37, %v427_v60 }
  0x38   :  { %v233_v5 = vstv %s1639_s24  ;;  %v238_v7 = vstv %s1645_s7  ;;  %v245_v8 = vstv %s1647_s30  ;;  %440 = vrot.lane.b32.xlu1 %v435_v59, %s1294_s0  ;;  %v134_v32 = vadd.f32 %v132_v44, %v127_v28  ;;  %p1250_p9 = pnand %p1249_p8, %p1243_p5 }
  0x39   :  { %v135_v34 = vadd.f32 %v133_v52, %v128_v3  ;;  %v235_v9 = vmul.f32 %v1490_v51, %v233_v5  ;;  %v240_v10 = vmul.f32 %v1500_v56, %v238_v7  ;;  %438 = vrot.lane.b32.xlu0 %v434_v4, %s1294_s0  ;;  %v247_v22 = vmul.f32 %v1505_v57, %v245_v8 }
  0x3a   :  { %v252_v33 = vstv %s1655_s23  ;;  %v234_v23 = vmul.f32 %v1510_v58, %v233_v5  ;;  %v239_v41 = vmul.f32 %v1521_v0, %v238_v7  ;;  %v141_v11 = vadd.f32 %v139_v24, %v134_v32 }
  0x3b   :  { %v142_v12 = vadd.f32 %v140_v62, %v135_v34  ;;  %v242_v13 = vadd.f32 %v240_v10, %v235_v9  ;;  %v254_v14 = vmul.f32 %v1516_v63, %v252_v33  ;;  %v246_v56 = vmul.f32 %v1526_v1, %v245_v8 }
  0x3c   :  { %v241_v51 = vadd.f32 %v239_v41, %v234_v23  ;;  %v253_v15 = vmul.f32 %v1536_v6, %v252_v33  ;;  %v342_v16 = vstv %s1661_s10  ;;  %v148_v57 = vadd.f32 %v146_v61, %v141_v11 }
  0x3d   :  { %v149_v17 = vadd.f32 %v147_v2, %v142_v12  ;;  %v249_v18 = vadd.f32 %v247_v22, %v242_v13  ;;  %v344_v58 = vmul.f32 %v1569_v31, %v342_v16  ;;  %v347_v20 = vstv %s1668_s8 }
  0x3e   :  { %v248_v19 = vadd.f32 %v246_v56, %v241_v51  ;;  %v354_v0 = vstv %s1673_s11  ;;  %v361_v21 = vstv %s1675_s9  ;;  %151 = vst.msk [vmem:[#allocation2] sm:$0xff] %vm150_vm14, %v148_v57  ;;  %v349_v25 = vmul.f32 %v1589_v45, %v347_v20 }
  0x3f   :  { %152 = vst.msk [vmem:[#allocation2 + $0x8] sm:$0xff] %vm150_vm14, %v149_v17  ;;  %v256_v63 = vadd.f32 %v254_v14, %v249_v18  ;;  %v356_v1 = vmul.f32 %v1594_v46, %v354_v0  ;;  %v343_v26 = vmul.f32 %v1579_v39, %v342_v16  ;;  %v348_v27 = vmul.f32 %v1599_v47, %v347_v20 }
  0x40   :  { %v255_v6 = vadd.f32 %v253_v15, %v248_v19  ;;  %v355_v31 = vmul.f32 %v1610_v54, %v354_v0  ;;  %v351_v29 = vadd.f32 %v349_v25, %v344_v58  ;;  %v363_v30 = vmul.f32 %v1605_v53, %v361_v21 }
  0x41   :  { %259 = vst.msk [vmem:[#allocation2 + $0x38] sm:$0xff] %vm150_vm14, %v256_v63  ;;  %v350_v35 = vadd.f32 %v348_v27, %v343_v26  ;;  %v362_v36 = vmul.f32 %v1615_v55, %v361_v21  ;;  %vm470_vm15 = vcmask 302088  }
  0x42   :  { %258 = vst.msk [vmem:[#allocation2 + $0x30] sm:$0xff] %vm150_vm14, %v255_v6  ;;  %v358_v45 = vadd.f32 %v356_v1, %v351_v29 }
  0x43   :  { %v357_v37 = vadd.f32 %v355_v31, %v350_v35 }
  0x44   :  { %v365_v46 = vadd.f32 %v363_v30, %v358_v45 }
  0x45   :  { %v364_v38 = vadd.f32 %v362_v36, %v357_v37  ;;  %v475_v31 = vld [vmem:[#allocation2] sm:$0xff]  ;;  %v1744_v36 = vld [vmem:[%s2049_s1 + $0x9] sm:$0xff] }
  0x46   :  { %368 = vst.msk [vmem:[#allocation2 + $0x68] sm:$0xff] %vm150_vm14, %v365_v46  ;;  %v476_v27 = vld [vmem:[#allocation2 + $0x8] sm:$0xff] }
  0x47   :  { %367 = vst.msk [vmem:[#allocation2 + $0x60] sm:$0xff] %vm150_vm14, %v364_v38 }
  0x49   :  { %v563_v29 = vld [vmem:[#allocation2 + $0x30] sm:$0xff] }
  0x4d   :  { %v654_v26 = vld [vmem:[#allocation2 + $0x68] sm:$0xff] }
  0x96   :  { %v221_v39 = vpop.permute.xlu1 %220 }
  0x97   :  { %227 = vst.msk [vmem:[#allocation2 + $0x20] sm:$0xff] %vm150_vm14, %v221_v39  ;;  %v182_v47 = vpop.permute.xlu0 %181 }
  0x98   :  { %188 = vst.msk [vmem:[#allocation2 + $0x10] sm:$0xff] %vm150_vm14, %v182_v47  ;;  %v190_v53 = vadd.f32 %v182_v47, %v148_v57 }
  0x9a   :  { %v223_v54 = vpop.permute.xlu1 %222  ;;  %v229_v55 = vadd.f32 %v221_v39, %v190_v53 }
  0x9b   :  { %228 = vst.msk [vmem:[#allocation2 + $0x28] sm:$0xff] %vm150_vm14, %v223_v54  ;;  %v184_v40 = vpop.permute.xlu0 %183 }
  0x9c   :  { %189 = vst.msk [vmem:[#allocation2 + $0x18] sm:$0xff] %vm150_vm14, %v184_v40  ;;  %v191_v42 = vadd.f32 %v184_v40, %v149_v17  ;;  %v260_v50 = vadd.f32 %v255_v6, %v229_v55  ;;  %v564_v6 = vld [vmem:[#allocation2 + $0x38] sm:$0xff]  ;;  %v509_v55 = vld [vmem:[%s2049_s1] sm:$0xff] }
  0x9e   :  { %v230_v43 = vadd.f32 %v223_v54, %v191_v42  ;;  %v293_v44 = vpop.permute.xlu1 %292  ;;  %v525_v15 = vld [vmem:[#allocation2 + $0x20] sm:$0xff]  ;;  %v510_v54 = vld [vmem:[%s2049_s1 + $0x8] sm:$0xff] }
  0x9f   :  { %298 = vst.msk [vmem:[#allocation2 + $0x48] sm:$0xff] %vm150_vm14, %v293_v44  ;;  %v291_v48 = vpop.permute.xlu0 %290  ;;  %v487_v51 = vld [vmem:[#allocation2 + $0x10] sm:$0xff] }
  0xa0   :  { %v261_v49 = vadd.f32 %v256_v63, %v230_v43  ;;  %297 = vst.msk [vmem:[#allocation2 + $0x40] sm:$0xff] %vm150_vm14, %v291_v48  ;;  %v299_v59 = vadd.f32 %v291_v48, %v260_v50  ;;  %v599_v43 = vld [vmem:[%s2049_s1 + $0x1] sm:$0xff] }
  0xa2   :  { %v300_v52 = vadd.f32 %v293_v44, %v261_v49  ;;  %v332_v60 = vpop.permute.xlu1 %331  ;;  %v526_v56 = vld [vmem:[#allocation2 + $0x28] sm:$0xff] }
  0xa3   :  { %337 = vst.msk [vmem:[#allocation2 + $0x58] sm:$0xff] %vm150_vm14, %v332_v60  ;;  %v330_v24 = vpop.permute.xlu0 %329  ;;  %v488_v14 = vld [vmem:[#allocation2 + $0x18] sm:$0xff]  ;;  %v1758_v44 = vld [vmem:[%s2049_s1 + $0xa] sm:$0xff] }
  0xa4   :  { %v339_v61 = vadd.f32 %v332_v60, %v300_v52  ;;  %336 = vst.msk [vmem:[#allocation2 + $0x50] sm:$0xff] %vm150_vm14, %v330_v24  ;;  %v338_v28 = vadd.f32 %v330_v24, %v299_v59  ;;  %v653_v60 = vld [vmem:[#allocation2 + $0x60] sm:$0xff] }
  0xa6   :  { %v370_v62 = vadd.f32 %v365_v46, %v339_v61  ;;  %v402_v2 = vpop.permute.xlu1 %401  ;;  %v369_v3 = vadd.f32 %v364_v38, %v338_v28  ;;  %v578_v16 = vld [vmem:[#allocation2 + $0x48] sm:$0xff] }
  0xa7   :  { %407 = vst.msk [vmem:[#allocation2 + $0x78] sm:$0xff] %vm150_vm14, %v402_v2  ;;  %v400_v4 = vpop.permute.xlu0 %399  ;;  %v577_v57 = vld [vmem:[#allocation2 + $0x40] sm:$0xff] }
  0xa8   :  { %406 = vst.msk [vmem:[#allocation2 + $0x70] sm:$0xff] %vm150_vm14, %v400_v4  ;;  %v409_v5 = vadd.f32 %v402_v2, %v370_v62  ;;  %v408_v7 = vadd.f32 %v400_v4, %v369_v3  ;;  %v1770_v28 = vld [vmem:[%s2049_s1 + $0x2] sm:$0xff] }
  0xaa   :  { %v441_v8 = vpop.permute.xlu1 %440  ;;  %v616_v17 = vld [vmem:[#allocation2 + $0x58] sm:$0xff] }
  0xab   :  { %446 = vst.msk [vmem:[#allocation2 + $0x88] sm:$0xff] %vm150_vm14, %v441_v8  ;;  %v448_v32 = vadd.f32 %v441_v8, %v409_v5  ;;  %v439_v34 = vpop.permute.xlu0 %438  ;;  %v615_v18 = vld [vmem:[#allocation2 + $0x50] sm:$0xff] }
  0xac   :  { %445 = vst.msk [vmem:[#allocation2 + $0x80] sm:$0xff] %vm150_vm14, %v439_v34  ;;  %v447_v9 = vadd.f32 %v439_v34, %v408_v7 }
  0xad   :  { %v1207_v10 = vadd.f32 -1.0, %v448_v32 }
  0xae   :  { %v1206_v22 = vadd.f32 -1.0, %v447_v9  ;;  %v668_v58 = vld [vmem:[#allocation2 + $0x78] sm:$0xff] }
  0xaf   :  { %v452_v33 = vmax.f32 %v1207_v10, 0.0  ;;  %v667_v19 = vld [vmem:[#allocation2 + $0x70] sm:$0xff] }
  0xb0   :  { %v451_v23 = vmax.f32 %v1206_v22, 0.0 }
  0xb1   :  { %v454_v41 = vmin.f32 %v452_v33, 1.0 }
  0xb2   :  { %v453_v11 = vmin.f32 %v451_v23, 1.0  ;;  %v706_v20 = vld [vmem:[#allocation2 + $0x88] sm:$0xff] }
  0xb3   :  { %458 = vst.msk [vmem:[#allocation8 + $0x8] sm:$0xff] %vm150_vm14, %v454_v41  ;;  %v456_v12 = vsub.f32 1.0, %v454_v41  ;;  %v705_v0 = vld [vmem:[#allocation2 + $0x80] sm:$0xff] }
  0xb4   :  { %457 = vst.msk [vmem:[#allocation8] sm:$0xff] %vm150_vm14, %v453_v11  ;;  %v455_v13 = vsub.f32 1.0, %v453_v11 }
  0xb5   :  { %466 = vrot.lane.b32.xlu1 %v456_v12, %s1296_s28 }
  0xb6   :  { %464 = vrot.lane.b32.xlu0 %v455_v13, %s1296_s28 }
  0xb9   :  { %493 = vrot.lane.b32.xlu1 %v488_v14, %s1296_s28 }
  0xba   :  { %491 = vrot.lane.b32.xlu0 %v487_v51, %s1296_s28 }
  0xbd   :  { %531 = vrot.lane.b32.xlu1 %v526_v56, %s1297_s12 }
  0xbe   :  { %529 = vrot.lane.b32.xlu0 %v525_v15, %s1297_s12 }
  0xc1   :  { %583 = vrot.lane.b32.xlu1 %v578_v16, %s1296_s28 }
  0xc2   :  { %581 = vrot.lane.b32.xlu0 %v577_v57, %s1296_s28 }
  0xc5   :  { %621 = vrot.lane.b32.xlu1 %v616_v17, %s1297_s12 }
  0xc6   :  { %619 = vrot.lane.b32.xlu0 %v615_v18, %s1297_s12 }
  0xc9   :  { %673 = vrot.lane.b32.xlu1 %v668_v58, %s1296_s28 }
  0xca   :  { %671 = vrot.lane.b32.xlu0 %v667_v19, %s1296_s28 }
  0xcd   :  { %711 = vrot.lane.b32.xlu1 %v706_v20, %s1297_s12 }
  0xce   :  { %709 = vrot.lane.b32.xlu0 %v705_v0, %s1297_s12 }
 0x127   :  { %v467_v21 = vpop.permute.xlu1 %466 }
 0x128   :  { %472 = vst.msk [vmem:[#allocation3 + $0x9] sm:$0xff] %vm470_vm15, %v467_v21  ;;  %v465_v63 = vpop.permute.xlu0 %464 }
 0x129   :  { %471 = vst.msk [vmem:[#allocation3 + $0x1] sm:$0xff] %vm470_vm15, %v465_v63 }
 0x12b   :  { %v494_v25 = vpop.permute.xlu1 %493 }
 0x12c   :  { %v492_v1 = vpop.permute.xlu0 %491 }
 0x12f   :  { %v532_v30 = vpop.permute.xlu1 %531  ;;  %v576_v35 = vld [vmem:[#allocation3 + $0x9] sm:$0xff] }
 0x130   :  { %v666_v45 = vld [vmem:[#allocation3 + $0xa] sm:$0xff]  ;;  %v485_v46 = vld [vmem:[#allocation3] sm:$0xff]  ;;  %v530_v38 = vpop.permute.xlu0 %529  ;;  %v566_v47 = vmul.f32 %v576_v35, %v564_v6 }
 0x131   :  { %v486_v37 = vld [vmem:[#allocation3 + $0x8] sm:$0xff]  ;;  %v656_v53 = vmul.f32 %v666_v45, %v654_v26  ;;  %v497_v42 = vmul.f32 %v492_v1, %v485_v46  ;;  %v477_v50 = vmul.f32 %v485_v46, %v475_v31  ;;  %v535_v8 = vmul.f32 %v530_v38, %v485_v46 }
 0x132   :  { %v575_v39 = vld [vmem:[#allocation3 + $0x1] sm:$0xff]  ;;  %v498_v40 = vmul.f32 %v494_v25, %v486_v37  ;;  %v478_v49 = vmul.f32 %v486_v37, %v476_v27  ;;  %568 = vst.msk [vmem:[#allocation2 + $0x38] sm:$0xff] %vm150_vm14, %v566_v47  ;;  %v1762_v52 = vmul.f32 %v1744_v36, %v566_v47  ;;  %v536_v4 = vmul.f32 %v532_v30, %v486_v37 }
 0x133   :  { %v665_v48 = vld [vmem:[#allocation3 + $0x2] sm:$0xff]  ;;  %v565_v59 = vmul.f32 %v575_v39, %v563_v29  ;;  %658 = vst.msk [vmem:[#allocation2 + $0x68] sm:$0xff] %vm150_vm14, %v656_v53  ;;  %v584_v24 = vpop.permute.xlu1 %583  ;;  %501 = vrot.lane.b32.xlu0 %v497_v42, %s1295_s18  ;;  %479 = vst.msk [vmem:[#allocation2] sm:$0xff] %vm150_vm14, %v477_v50  ;;  %v1776_v2 = vmul.f32 %v509_v55, %v477_v50  ;;  %v1782_v5 = vmul.f32 %v1758_v44, %v656_v53 }
 0x134   :  { %503 = vrot.lane.b32.xlu1 %v498_v40, %s1295_s18  ;;  %v582_v61 = vpop.permute.xlu0 %581  ;;  %480 = vst.msk [vmem:[#allocation2 + $0x8] sm:$0xff] %vm150_vm14, %v478_v49  ;;  %v1773_v62 = vmul.f32 %v510_v54, %v478_v49  ;;  %v655_v7 = vmul.f32 %v665_v48, %v653_v60  ;;  %v588_v22 = vmul.f32 %v584_v24, %v576_v35 }
 0x135   :  { %567 = vst.msk [vmem:[#allocation2 + $0x30] sm:$0xff] %vm150_vm14, %v565_v59  ;;  %v1779_v3 = vmul.f32 %v599_v43, %v565_v59  ;;  %v587_v23 = vmul.f32 %v582_v61, %v575_v39  ;;  %v512_v17 = vmul.f32 %v510_v54, %v498_v40  ;;  %v511_v18 = vmul.f32 %v509_v55, %v497_v42 }
 0x136   :  { %657 = vst.msk [vmem:[#allocation2 + $0x60] sm:$0xff] %vm150_vm14, %v655_v7  ;;  %v1787_v34 = vmul.f32 %v1770_v28, %v655_v7  ;;  %v550_v58 = vmul.f32 %v536_v4, %v510_v54  ;;  %v549_v19 = vmul.f32 %v535_v8, %v509_v55  ;;  %v602_v20 = vmul.f32 %v1744_v36, %v588_v22 }
 0x137   :  { %v622_v32 = vpop.permute.xlu1 %621  ;;  %539 = vrot.lane.b32.xlu0 %v535_v8, %s1294_s0  ;;  %v601_v0 = vmul.f32 %v599_v43, %v587_v23 }
 0x138   :  { %541 = vrot.lane.b32.xlu1 %v536_v4, %s1294_s0  ;;  %v626_v9 = vmul.f32 %v622_v32, %v576_v35  ;;  %v620_v10 = vpop.permute.xlu0 %619 }
 0x139   :  { %v625_v33 = vmul.f32 %v620_v10, %v575_v39  ;;  %v1889_v10 = vld [vmem:[%s2049_s1 + $0x20] sm:$0xff] }
 0x13a   :  { %v1791_v41 = vmul.f32 %v626_v9, %v1744_v36 }
 0x13b   :  { %v1793_v11 = vmul.f32 %v625_v33, %v599_v43  ;;  %591 = vrot.lane.b32.xlu0 %v587_v23, %s1295_s18  ;;  %v674_v12 = vpop.permute.xlu1 %673 }
 0x13c   :  { %593 = vrot.lane.b32.xlu1 %v588_v22, %s1295_s18  ;;  %v672_v13 = vpop.permute.xlu0 %671  ;;  %v1799_v14 = vmul.f32 %v674_v12, %v666_v45 }
 0x13d   :  { %v1801_v51 = vmul.f32 %v672_v13, %v665_v48  ;;  %v1909_v13 = vld [vmem:[%s2049_s1 + $0x30] sm:$0xff] }
 0x13f   :  { %629 = vrot.lane.b32.xlu0 %v625_v33, %s1294_s0  ;;  %v712_v56 = vpop.permute.xlu1 %711  ;;  %v691_v4 = vmul.f32 %v1770_v28, %v1801_v51 }
 0x140   :  { %631 = vrot.lane.b32.xlu1 %v626_v9, %s1294_s0  ;;  %v710_v15 = vpop.permute.xlu0 %709  ;;  %v1807_v16 = vmul.f32 %v712_v56, %v666_v45 }
 0x141   :  { %v1809_v57 = vmul.f32 %v710_v15, %v665_v48 }
 0x142   :  { %v730_v7 = vmul.f32 %v1807_v16, %v1758_v44 }
 0x143   :  { %681 = vrot.lane.b32.xlu0 %v1801_v51, %s1295_s18  ;;  %v729_v8 = vmul.f32 %v1809_v57, %v1770_v28 }
 0x144   :  { %683 = vrot.lane.b32.xlu1 %v1799_v14, %s1295_s18 }
 0x147   :  { %719 = vrot.lane.b32.xlu0 %v1809_v57, %s1294_s0 }
 0x148   :  { %721 = vrot.lane.b32.xlu1 %v1807_v16, %s1294_s0 }
 0x14b   :  { %515 = vrot.lane.b32.xlu0 %v511_v18, %s1295_s18 }
 0x14c   :  { %517 = vrot.lane.b32.xlu1 %v512_v17, %s1295_s18 }
 0x14f   :  { %553 = vrot.lane.b32.xlu0 %v549_v19, %s1294_s0 }
 0x150   :  { %555 = vrot.lane.b32.xlu1 %v550_v58, %s1294_s0 }
 0x153   :  { %605 = vrot.lane.b32.xlu0 %v601_v0, %s1295_s18 }
 0x154   :  { %607 = vrot.lane.b32.xlu1 %v602_v20, %s1295_s18  ;;  %v1925_v20 = vld [vmem:[%s2049_s1 + $0x21] sm:$0xff] }
 0x1a5   :  { %v502_v63 = vpop.permute.xlu0 %501 }
 0x1a6   :  { %v504_v21 = vpop.permute.xlu1 %503  ;;  %507 = vst.msk [vmem:[#allocation2 + $0x10] sm:$0xff] %vm150_vm14, %v502_v63  ;;  %v1931_v63 = vld [vmem:[%s2049_s1 + $0x19] sm:$0xff] }
 0x1a7   :  { %508 = vst.msk [vmem:[#allocation2 + $0x18] sm:$0xff] %vm150_vm14, %v504_v21 }
 0x1a9   :  { %v540_v1 = vpop.permute.xlu0 %539 }
 0x1aa   :  { %v542_v25 = vpop.permute.xlu1 %541  ;;  %545 = vst.msk [vmem:[#allocation2 + $0x20] sm:$0xff] %vm150_vm14, %v540_v1 }
 0x1ab   :  { %546 = vst.msk [vmem:[#allocation2 + $0x28] sm:$0xff] %vm150_vm14, %v542_v25 }
 0x1ad   :  { %v592_v27 = vpop.permute.xlu0 %591  ;;  %v750_v31 = vld [vmem:[#allocation2 + $0x10] sm:$0xff] }
 0x1ae   :  { %v594_v6 = vpop.permute.xlu1 %593  ;;  %v751_v26 = vld [vmem:[#allocation2 + $0x18] sm:$0xff]  ;;  %597 = vst.msk [vmem:[#allocation2 + $0x40] sm:$0xff] %vm150_vm14, %v592_v27  ;;  %754 = vrot.lane.b32.xlu0 %v750_v31, %s1296_s28 }
 0x1af   :  { %598 = vst.msk [vmem:[#allocation2 + $0x48] sm:$0xff] %vm150_vm14, %v594_v6  ;;  %756 = vrot.lane.b32.xlu1 %v751_v26, %s1296_s28  ;;  %v1939_v6 = vld [vmem:[%s2049_s1 + $0x39] sm:$0xff] }
 0x1b1   :  { %v630_v30 = vpop.permute.xlu0 %629  ;;  %v772_v37 = vld [vmem:[#allocation2 + $0x20] sm:$0xff] }
 0x1b2   :  { %v632_v29 = vpop.permute.xlu1 %631  ;;  %635 = vst.msk [vmem:[#allocation2 + $0x50] sm:$0xff] %vm150_vm14, %v630_v30  ;;  %912 = vrot.lane.b32.xlu0 %v750_v31, %s1296_s28  ;;  %v773_v36 = vld [vmem:[#allocation2 + $0x28] sm:$0xff]  ;;  %v1945_v31 = vld [vmem:[%s2049_s1 + $0x31] sm:$0xff] }
 0x1b3   :  { %636 = vst.msk [vmem:[#allocation2 + $0x58] sm:$0xff] %vm150_vm14, %v632_v29  ;;  %914 = vrot.lane.b32.xlu1 %v751_v26, %s1296_s28 }
 0x1b5   :  { %v682_v45 = vpop.permute.xlu0 %681  ;;  %v802_v54 = vld [vmem:[#allocation2 + $0x40] sm:$0xff] }
 0x1b6   :  { %v684_v35 = vpop.permute.xlu1 %683  ;;  %687 = vst.msk [vmem:[#allocation2 + $0x70] sm:$0xff] %vm150_vm14, %v682_v45  ;;  %776 = vrot.lane.b32.xlu0 %v772_v37, %s1297_s12  ;;  %v803_v47 = vld [vmem:[#allocation2 + $0x48] sm:$0xff] }
 0x1b7   :  { %688 = vst.msk [vmem:[#allocation2 + $0x78] sm:$0xff] %vm150_vm14, %v684_v35  ;;  %778 = vrot.lane.b32.xlu1 %v773_v36, %s1297_s12 }
 0x1b9   :  { %v720_v38 = vpop.permute.xlu0 %719  ;;  %v824_v24 = vld [vmem:[#allocation2 + $0x50] sm:$0xff] }
 0x1ba   :  { %v722_v46 = vpop.permute.xlu1 %721  ;;  %725 = vst.msk [vmem:[#allocation2 + $0x80] sm:$0xff] %vm150_vm14, %v720_v38  ;;  %934 = vrot.lane.b32.xlu0 %v772_v37, %s1297_s12  ;;  %v825_v60 = vld [vmem:[#allocation2 + $0x58] sm:$0xff] }
 0x1bb   :  { %726 = vst.msk [vmem:[#allocation2 + $0x88] sm:$0xff] %vm150_vm14, %v722_v46  ;;  %936 = vrot.lane.b32.xlu1 %v773_v36, %s1297_s12 }
 0x1bd   :  { %v516_v53 = vpop.permute.xlu0 %515 }
 0x1be   :  { %v518_v39 = vpop.permute.xlu1 %517  ;;  %806 = vrot.lane.b32.xlu0 %v802_v54, %s1296_s28  ;;  %v521_v55 = vadd.f32 %v516_v53, %v1776_v2  ;;  %v855_v61 = vld [vmem:[#allocation2 + $0x78] sm:$0xff]  ;;  %v1961_v53 = vld [vmem:[%s2049_s1 + $0x22] sm:$0xff] }
 0x1bf   :  { %808 = vrot.lane.b32.xlu1 %v803_v47, %s1296_s28  ;;  %v522_v40 = vadd.f32 %v518_v39, %v1773_v62  ;;  %v854_v62 = vld [vmem:[#allocation2 + $0x70] sm:$0xff] }
 0x1c1   :  { %v554_v48 = vpop.permute.xlu0 %553  ;;  %v876_v2 = vld [vmem:[#allocation2 + $0x80] sm:$0xff] }
 0x1c2   :  { %v556_v42 = vpop.permute.xlu1 %555  ;;  %v559_v49 = vadd.f32 %v554_v48, %v521_v55  ;;  %964 = vrot.lane.b32.xlu0 %v802_v54, %s1296_s28  ;;  %v1967_v55 = vld [vmem:[%s2049_s1 + $0x1a] sm:$0xff] }
 0x1c3   :  { %v560_v43 = vadd.f32 %v556_v42, %v522_v40  ;;  %966 = vrot.lane.b32.xlu1 %v803_v47, %s1296_s28  ;;  %v1975_v48 = vld [vmem:[%s2049_s1 + $0x3a] sm:$0xff] }
 0x1c4   :  { %v1852_v59 = vadd.f32 %v1779_v3, %v559_v49  ;;  %v692_v3 = vmul.f32 %v1758_v44, %v1799_v14  ;;  %v1895_v44 = vld [vmem:[%s2049_s1 + $0x18] sm:$0xff] }
 0x1c5   :  { %v1849_v50 = vadd.f32 %v1762_v52, %v560_v43  ;;  %v877_v52 = vld [vmem:[#allocation2 + $0x88] sm:$0xff]  ;;  %v1884_v9 = vpop.permute.xlu0 %605 }
 0x1c6   :  { %828 = vrot.lane.b32.xlu0 %v824_v24, %s1297_s12  ;;  %v1882_v32 = vpop.permute.xlu1 %607 }
 0x1c7   :  { %830 = vrot.lane.b32.xlu1 %v825_v60, %s1297_s12 }
 0x1ca   :  { %986 = vrot.lane.b32.xlu0 %v824_v24, %s1297_s12  ;;  %v1981_v24 = vld [vmem:[%s2049_s1 + $0x32] sm:$0xff] }
 0x1cb   :  { %988 = vrot.lane.b32.xlu1 %v825_v60, %s1297_s12 }
 0x1ce   :  { %858 = vrot.lane.b32.xlu0 %v854_v62, %s1296_s28 }
 0x1cf   :  { %860 = vrot.lane.b32.xlu1 %v855_v61, %s1296_s28 }
 0x1d2   :  { %1016 = vrot.lane.b32.xlu0 %v854_v62, %s1296_s28 }
 0x1d3   :  { %1018 = vrot.lane.b32.xlu1 %v855_v61, %s1296_s28 }
 0x1d6   :  { %880 = vrot.lane.b32.xlu0 %v876_v2, %s1297_s12 }
 0x1d7   :  { %882 = vrot.lane.b32.xlu1 %v877_v52, %s1297_s12 }
 0x1da   :  { %1038 = vrot.lane.b32.xlu0 %v876_v2, %s1297_s12 }
 0x1db   :  { %1040 = vrot.lane.b32.xlu1 %v877_v52, %s1297_s12 }
 0x1de   :  { %643 = vrot.lane.b32.xlu0 %v1793_v11, %s1294_s0 }
 0x1df   :  { %645 = vrot.lane.b32.xlu1 %v1791_v41, %s1294_s0  ;;  %v1903_v41 = vld [vmem:[%s2049_s1 + $0x38] sm:$0xff] }
 0x1e2   :  { %695 = vrot.lane.b32.xlu0 %v691_v4, %s1295_s18 }
 0x1e3   :  { %697 = vrot.lane.b32.xlu1 %v692_v3, %s1295_s18 }
 0x1e6   :  { %733 = vrot.lane.b32.xlu0 %v729_v8, %s1294_s0 }
 0x1e7   :  { %735 = vrot.lane.b32.xlu1 %v730_v7, %s1294_s0 }
 0x220   :  { %v755_v28 = vpop.permute.xlu0 %754 }
 0x221   :  { %v757_v22 = vpop.permute.xlu1 %756  ;;  %v760_v23 = vmul.f32 %v1895_v44, %v755_v28 }
 0x222   :  { %v761_v33 = vmul.f32 %v1889_v10, %v757_v22 }
 0x223   :  { %764 = vrot.lane.b32.xlu0 %v760_v23, %s1295_s18 }
 0x224   :  { %766 = vrot.lane.b32.xlu1 %v761_v33, %s1295_s18  ;;  %v913_v14 = vpop.permute.xlu0 %912 }
 0x225   :  { %v915_v11 = vpop.permute.xlu1 %914  ;;  %v918_v51 = vmul.f32 %v1909_v13, %v913_v14 }
 0x226   :  { %v919_v12 = vmul.f32 %v1903_v41, %v915_v11 }
 0x227   :  { %922 = vrot.lane.b32.xlu0 %v918_v51, %s1295_s18 }
 0x228   :  { %924 = vrot.lane.b32.xlu1 %v919_v12, %s1295_s18  ;;  %v777_v16 = vpop.permute.xlu0 %776 }
 0x229   :  { %v779_v56 = vpop.permute.xlu1 %778  ;;  %v782_v57 = vmul.f32 %v1895_v44, %v777_v16 }
 0x22a   :  { %v783_v15 = vmul.f32 %v1889_v10, %v779_v56 }
 0x22b   :  { %786 = vrot.lane.b32.xlu0 %v782_v57, %s1294_s0 }
 0x22c   :  { %788 = vrot.lane.b32.xlu1 %v783_v15, %s1294_s0  ;;  %v935_v58 = vpop.permute.xlu0 %934 }
 0x22d   :  { %v937_v17 = vpop.permute.xlu1 %936  ;;  %v940_v19 = vmul.f32 %v1909_v13, %v935_v58 }
 0x22e   :  { %v941_v18 = vmul.f32 %v1903_v41, %v937_v17 }
 0x22f   :  { %944 = vrot.lane.b32.xlu0 %v940_v19, %s1294_s0 }
 0x230   :  { %946 = vrot.lane.b32.xlu1 %v941_v18, %s1294_s0  ;;  %v807_v25 = vpop.permute.xlu0 %806 }
 0x231   :  { %v809_v0 = vpop.permute.xlu1 %808  ;;  %v812_v1 = vmul.f32 %v1931_v63, %v807_v25 }
 0x232   :  { %v813_v21 = vmul.f32 %v1925_v20, %v809_v0 }
 0x233   :  { %816 = vrot.lane.b32.xlu0 %v812_v1, %s1295_s18 }
 0x234   :  { %818 = vrot.lane.b32.xlu1 %v813_v21, %s1295_s18  ;;  %v965_v29 = vpop.permute.xlu0 %964 }
 0x235   :  { %v967_v26 = vpop.permute.xlu1 %966  ;;  %v970_v30 = vmul.f32 %v1945_v31, %v965_v29 }
 0x236   :  { %v971_v27 = vmul.f32 %v1939_v6, %v967_v26 }
 0x237   :  { %974 = vrot.lane.b32.xlu0 %v970_v30, %s1295_s18 }
 0x238   :  { %976 = vrot.lane.b32.xlu1 %v971_v27, %s1295_s18  ;;  %v829_v45 = vpop.permute.xlu0 %828 }
 0x239   :  { %v831_v35 = vpop.permute.xlu1 %830  ;;  %v834_v37 = vmul.f32 %v1931_v63, %v829_v45 }
 0x23a   :  { %v835_v36 = vmul.f32 %v1925_v20, %v831_v35 }
 0x23b   :  { %838 = vrot.lane.b32.xlu0 %v834_v37, %s1294_s0 }
 0x23c   :  { %840 = vrot.lane.b32.xlu1 %v835_v36, %s1294_s0  ;;  %v987_v39 = vpop.permute.xlu0 %986 }
 0x23d   :  { %v989_v46 = vpop.permute.xlu1 %988  ;;  %v992_v47 = vmul.f32 %v1945_v31, %v987_v39 }
 0x23e   :  { %v993_v38 = vmul.f32 %v1939_v6, %v989_v46 }
 0x23f   :  { %996 = vrot.lane.b32.xlu0 %v992_v47, %s1294_s0 }
 0x240   :  { %998 = vrot.lane.b32.xlu1 %v993_v38, %s1294_s0  ;;  %v859_v42 = vpop.permute.xlu0 %858 }
 0x241   :  { %v861_v54 = vpop.permute.xlu1 %860  ;;  %v864_v43 = vmul.f32 %v1967_v55, %v859_v42 }
 0x242   :  { %v865_v40 = vmul.f32 %v1961_v53, %v861_v54 }
 0x243   :  { %868 = vrot.lane.b32.xlu0 %v864_v43, %s1295_s18 }
 0x244   :  { %870 = vrot.lane.b32.xlu1 %v865_v40, %s1295_s18  ;;  %v1017_v61 = vpop.permute.xlu0 %1016 }
 0x245   :  { %v1019_v49 = vpop.permute.xlu1 %1018  ;;  %v1022_v62 = vmul.f32 %v1981_v24, %v1017_v61 }
 0x246   :  { %v1023_v60 = vmul.f32 %v1975_v48, %v1019_v49 }
 0x247   :  { %1026 = vrot.lane.b32.xlu0 %v1022_v62, %s1295_s18 }
 0x248   :  { %1028 = vrot.lane.b32.xlu1 %v1023_v60, %s1295_s18  ;;  %v881_v3 = vpop.permute.xlu0 %880 }
 0x249   :  { %v883_v52 = vpop.permute.xlu1 %882  ;;  %v886_v4 = vmul.f32 %v1967_v55, %v881_v3 }
 0x24a   :  { %v887_v2 = vmul.f32 %v1961_v53, %v883_v52 }
 0x24b   :  { %1253 = shalt.err (!%p1250_p9)
}
 0x24c   :  { %s1254_s18 = scalar_lea.hbm %s2053_s5, 256 }
 0x24d   :  { %p1255_p10 = scmp.ne.s32.totalorder %s2053_s5, %s1254_s18  ;;  %p1258_p11 = scmp.lt.u32.totalorder %s1254_s18, %s2053_s5 }
 0x24f   :  { %p1260_p12 = pnand %p1258_p11, %p1255_p10 }
 0x251   :  { %1263 = shalt.err (!%p1260_p12)
}
 0x252   :  { %s1299_s30 = smov 128   ;;  %s1300_s23 = smov 8   ;;  %892 = vrot.lane.b32.xlu1 %v887_v2, %s1294_s0  ;;  %890 = vrot.lane.b32.xlu0 %v886_v4, %s1294_s0  ;;  %v1041_v7 = vpop.permute.xlu1 %1040  ;;  %v1039_v22 = vpop.permute.xlu0 %1038  ;;  %v612_v28 = vadd.f32 %v1882_v32, %v1849_v50  ;;  %v611_v23 = vadd.f32 %v1884_v9, %v1852_v59  ;;  %v747_v29 = vld [vmem:[#allocation2 + $0x8] sm:$0xff]  ;;  %v746_v30 = vld [vmem:[#allocation2] sm:$0xff]  ;;  %v797_v39 = vld [vmem:[#allocation2 + $0x38] sm:$0xff] }
 0x253   :  { %1084 = dma.vmem_to_hbm [thread:$0]  %s1079_s15, 256, %s2053_s5, [#allocation9], %s1299_s30, %s1299_s30, %s1300_s23   ;;  %v1045_v8 = vmul.f32 %v1975_v48, %v1041_v7  ;;  %v1044_v33 = vmul.f32 %v1981_v24, %v1039_v22  ;;  %v749_v36 = vmul.f32 %v1889_v10, %v747_v29  ;;  %v748_v37 = vmul.f32 %v1895_v44, %v746_v30  ;;  %v796_v42 = vld [vmem:[#allocation2 + $0x30] sm:$0xff] }
 0x254   :  { %v907_v54 = vmul.f32 %v1903_v41, %v747_v29  ;;  %v906_v49 = vmul.f32 %v1909_v13, %v746_v30  ;;  %v799_v62 = vmul.f32 %v1925_v20, %v797_v39  ;;  %v798_v10 = vmul.f32 %v1931_v63, %v796_v42  ;;  %v849_v13 = vld [vmem:[#allocation2 + $0x68] sm:$0xff]  ;;  %v848_v20 = vld [vmem:[#allocation2 + $0x60] sm:$0xff]  ;;  %s1301_s5 = smov [#allocation7]  }
 0x255   :  { %v957_v41 = vmul.f32 %v1939_v6, %v797_v39 }
 0x256   :  { %1050 = vrot.lane.b32.xlu1 %v1045_v8, %s1294_s0  ;;  %1048 = vrot.lane.b32.xlu0 %v1044_v33, %s1294_s0  ;;  %v646_v11 = vpop.permute.xlu1 %645  ;;  %v644_v14 = vpop.permute.xlu0 %643  ;;  %s1064_s0 = sshll.u32 %s1301_s5, 4  ;;  %s1065_s0 = int_to_ptr.vmem [resolvable:$true] %s1064_s0 }
 0x257   :  { %v650_v12 = vadd.f32 %v646_v11, %v612_v28  ;;  %v649_v51 = vadd.f32 %v644_v14, %v611_v23  ;;  %v956_v28 = vmul.f32 %v1945_v31, %v796_v42  ;;  %s1264_s11 = scalar_lea.vmem %s1065_s0, 768  ;;  %p1269_p0 = scmp.lt.s32.totalorder %s1065_s0, %s1065_s0 }
 0x258   :  { %p1265_p13 = scmp.ne.s32.totalorder %s1065_s0, %s1264_s11  ;;  %p1270_p1 = scmp.lt.s32.totalorder %s1264_s11, %s1264_s11 }
 0x259   :  { %v664_v56 = vadd.f32 %v1782_v5, %v650_v12  ;;  %v663_v16 = vadd.f32 %v1787_v34, %v649_v51 }
 0x25a   :  { %v698_v15 = vpop.permute.xlu1 %697  ;;  %v696_v57 = vpop.permute.xlu0 %695  ;;  %p1271_p2 = por %p1270_p1, %p1269_p0 }
 0x25b   :  { %v702_v17 = vadd.f32 %v698_v15, %v664_v56  ;;  %v701_v18 = vadd.f32 %v696_v57, %v663_v16  ;;  %v851_v15 = vmul.f32 %v1961_v53, %v849_v13  ;;  %v850_v57 = vmul.f32 %v1967_v55, %v848_v20 }
 0x25c   :  { %p1272_p3 = pnand %p1271_p2, %p1265_p13 }
 0x25e   :  { %v736_v50 = vpop.permute.xlu1 %735  ;;  %v734_v58 = vpop.permute.xlu0 %733 }
 0x25f   :  { %v740_v32 = vadd.f32 %v736_v50, %v702_v17  ;;  %v739_v19 = vadd.f32 %v734_v58, %v701_v18 }
 0x261   :  { %742 = vst.msk [vmem:[#allocation7 + $0x8] sm:$0xff] %vm150_vm14, %v740_v32  ;;  %741 = vst.msk [vmem:[#allocation7] sm:$0xff] %vm150_vm14, %v739_v19  ;;  %v1009_v19 = vmul.f32 %v1975_v48, %v849_v13 }
 0x295   :  { %v765_v9 = vpop.permute.xlu0 %764 }
 0x296   :  { %v767_v59 = vpop.permute.xlu1 %766  ;;  %v770_v38 = vadd.f32 %v765_v9, %v748_v37  ;;  %v1008_v9 = vmul.f32 %v1981_v24, %v848_v20 }
 0x297   :  { %v771_v46 = vadd.f32 %v767_v59, %v749_v36 }
 0x299   :  { %v923_v21 = vpop.permute.xlu0 %922 }
 0x29a   :  { %v925_v0 = vpop.permute.xlu1 %924  ;;  %v928_v52 = vadd.f32 %v923_v21, %v906_v49 }
 0x29b   :  { %v929_v61 = vadd.f32 %v925_v0, %v907_v54 }
 0x29d   :  { %v787_v5 = vpop.permute.xlu0 %786 }
 0x29e   :  { %v789_v25 = vpop.permute.xlu1 %788  ;;  %v792_v60 = vadd.f32 %v787_v5, %v770_v38 }
 0x29f   :  { %v793_v40 = vadd.f32 %v789_v25, %v771_v46 }
 0x2a0   :  { %v800_v8 = vadd.f32 %v798_v10, %v792_v60 }
 0x2a1   :  { %v945_v26 = vpop.permute.xlu0 %944  ;;  %v801_v3 = vadd.f32 %v799_v62, %v793_v40 }
 0x2a2   :  { %v947_v1 = vpop.permute.xlu1 %946  ;;  %v950_v7 = vadd.f32 %v945_v26, %v928_v52 }
 0x2a3   :  { %v951_v44 = vadd.f32 %v947_v1, %v929_v61 }
 0x2a4   :  { %v958_v51 = vadd.f32 %v956_v28, %v950_v7 }
 0x2a5   :  { %v817_v27 = vpop.permute.xlu0 %816  ;;  %v959_v11 = vadd.f32 %v957_v41, %v951_v44 }
 0x2a6   :  { %v819_v34 = vpop.permute.xlu1 %818  ;;  %v822_v33 = vadd.f32 %v817_v27, %v800_v8 }
 0x2a7   :  { %v823_v22 = vadd.f32 %v819_v34, %v801_v3 }
 0x2a9   :  { %v975_v45 = vpop.permute.xlu0 %974 }
 0x2aa   :  { %v977_v35 = vpop.permute.xlu1 %976  ;;  %v980_v16 = vadd.f32 %v975_v45, %v958_v51 }
 0x2ab   :  { %v981_v56 = vadd.f32 %v977_v35, %v959_v11 }
 0x2ad   :  { %v839_v43 = vpop.permute.xlu0 %838 }
 0x2ae   :  { %v841_v47 = vpop.permute.xlu1 %840  ;;  %v844_v63 = vadd.f32 %v839_v43, %v822_v33 }
 0x2af   :  { %v845_v12 = vadd.f32 %v841_v47, %v823_v22 }
 0x2b0   :  { %v852_v31 = vadd.f32 %v850_v57, %v844_v63 }
 0x2b1   :  { %v997_v4 = vpop.permute.xlu0 %996  ;;  %v853_v6 = vadd.f32 %v851_v15, %v845_v12 }
 0x2b2   :  { %v999_v2 = vpop.permute.xlu1 %998  ;;  %v1002_v32 = vadd.f32 %v997_v4, %v980_v16 }
 0x2b3   :  { %v1003_v18 = vadd.f32 %v999_v2, %v981_v56 }
 0x2b4   :  { %v1010_v53 = vadd.f32 %v1008_v9, %v1002_v32 }
 0x2b5   :  { %v869_v14 = vpop.permute.xlu0 %868  ;;  %v1011_v21 = vadd.f32 %v1009_v19, %v1003_v18 }
 0x2b6   :  { %v871_v23 = vpop.permute.xlu1 %870  ;;  %v874_v59 = vadd.f32 %v869_v14, %v852_v31 }
 0x2b7   :  { %v875_v58 = vadd.f32 %v871_v23, %v853_v6 }
 0x2b9   :  { %v1027_v50 = vpop.permute.xlu0 %1026 }
 0x2ba   :  { %v1029_v17 = vpop.permute.xlu1 %1028  ;;  %v1032_v55 = vadd.f32 %v1027_v50, %v1010_v53 }
 0x2bb   :  { %v1033_v26 = vadd.f32 %v1029_v17, %v1011_v21 }
 0x2c4   :  { %v893_v0 = vpop.permute.xlu1 %892  ;;  %v891_v5 = vpop.permute.xlu0 %890 }
 0x2c5   :  { %v897_v25 = vadd.f32 %v893_v0, %v875_v58  ;;  %v896_v1 = vadd.f32 %v891_v5, %v874_v59 }
 0x2c7   :  { %900 = vst.msk [vmem:[#allocation7 + $0x18] sm:$0xff] %vm150_vm14, %v897_v25  ;;  %899 = vst.msk [vmem:[#allocation7 + $0x10] sm:$0xff] %vm150_vm14, %v896_v1 }
 0x2c8   :  { %v1051_v34 = vpop.permute.xlu1 %1050  ;;  %v1049_v48 = vpop.permute.xlu0 %1048 }
 0x2c9   :  { %v1055_v27 = vadd.f32 %v1051_v34, %v1033_v26  ;;  %v1054_v29 = vadd.f32 %v1049_v48, %v1032_v55 }
 0x2cb   :  { %1058 = vst.msk [vmem:[#allocation7 + $0x28] sm:$0xff] %vm150_vm14, %v1055_v27  ;;  %1057 = vst.msk [vmem:[#allocation7 + $0x20] sm:$0xff] %vm150_vm14, %v1054_v29 }
 0x2cc   :  { %1275 = shalt.err (!%p1272_p3)
}
 0x2cd   :  { %s1276_s12 = scalar_lea.hbm %s2051_s3, 768 }
 0x2ce   :  { %p1277_p4 = scmp.ne.s32.totalorder %s2051_s3, %s1276_s12  ;;  %p1280_p5 = scmp.lt.u32.totalorder %s1276_s12, %s2051_s3 }
 0x2d0   :  { %p1282_p6 = pnand %p1280_p5, %p1277_p4 }
 0x2d2   :  { %1285 = shalt.err (!%p1282_p6)
}
 0x2d3   :  { %1070 = dma.vmem_to_hbm [thread:$0]  %s1065_s0, 768, %s2051_s3, [#allocation5], %s1299_s30, %s1299_s30, %s1300_s23  }
 0x2d4   :  { %1288 = dma.done.wait [#allocation5], 768  }
 0x2d5   :  { %1289 = vsyncadd [#allocation5], 4294966528 }
 0x2d6   :  { %1290 = dma.done.wait [#allocation9], 256  }
 0x2d7   :  { %1291 = vsyncadd [#allocation9], 4294967040 }
 0x2d8   :  { %1093 = vsyncpa [#allocation5], 1 }
 0x2d9   :  { %1094 = vsyncpa [#allocation9], 1 }
 0x2da   :  { %1095 = vsyncpa [#allocation6], 1 }

</bundles_post_ra>
